<compile_context>
chip_gen: v7x
topology: tpu7x:2x2x1
jax: 0.10.0
libtpu: 0.0.40
codegen_flags: <defaults>
</compile_context>

<pallas_src>
from math import log

import jax
import jax.numpy as jnp
from jax.experimental import pallas as pl
from jax.experimental.pallas import tpu as pltpu


def _gfp_kernel(x_ref, w_ref, o_ref):
    half = w_ref.shape[-1]
    x = x_ref[...]                      # (tm, 1)    f32
    w = w_ref[...]                      # (1, half)  f32
    x_proj = x * w                      # (tm, half) lane-broadcast on the VPU
    # Two lane-aligned dense stores (sin half, cos half) -> one contiguous
    # (tm, 2*half) output tile; transcendentals go to the EUP slot.
    o_ref[:, :half] = jnp.sin(x_proj)
    o_ref[:, half:] = jnp.cos(x_proj)


def gaussian_fourier_projection_pallas(x, w, *, tm=2048):
    """x: (N,) times; w: (half,) fixed frequencies. Returns (N, 2*half) f32."""
    n = x.shape[0]
    half = w.shape[0]
    embed_dim = 2 * half

    # Biggest batch tile that is still a multiple of 8 (sublane constraint) and
    # not larger than the padded batch -> fewest grid steps (~0.35 us each).
    tm = max(8, min(tm, ((n + 7) // 8) * 8))
    n_pad = ((n + tm - 1) // tm) * tm

    x_col = x.astype(jnp.float32).reshape(n, 1)
    if n_pad != n:
        # Padded rows compute sin(0)/cos(0); they are sliced off before return.
        x_col = jnp.pad(x_col, ((0, n_pad - n), (0, 0)))
    w_row = w.astype(jnp.float32).reshape(1, half)

    grid = (n_pad // tm,)

    out = pl.pallas_call(
        _gfp_kernel,
        out_shape=jax.ShapeDtypeStruct((n_pad, embed_dim), jnp.float32),
        grid_spec=pltpu.PrefetchScalarGridSpec(
            num_scalar_prefetch=0,
            grid=grid,
            in_specs=[
                pl.BlockSpec((tm, 1), lambda i: (i, 0)),     # x column tile
                pl.BlockSpec((1, half), lambda i: (0, 0)),   # W (resident row)
            ],
            out_specs=pl.BlockSpec((tm, embed_dim), lambda i: (i, 0)),
        ),
        compiler_params=pltpu.CompilerParams(
            dimension_semantics=("parallel",),  # shards the batch across TCs on v7x
        ),
    )(x_col, w_row)

    return out[:n]


class GaussianFourierProjectionPallas:
    """JAX/Pallas port of the PyTorch GaussianFourierProjection module."""

    def __init__(self, embed_dim: int, scale: float = 30.0) -> None:
        half = embed_dim // 2
        self.embed_dim = embed_dim
        # Matches the PyTorch module exactly: the `scale` ctor arg is overwritten.
        self.scale = log(10000) / half
        self.W = jnp.exp(jnp.arange(half, dtype=jnp.float32) * self.scale)

    def forward(self, x, *, tm=2048):
        return gaussian_fourier_projection_pallas(x, self.W, tm=tm)

    __call__ = forward


def _reference_forward(x, w):
    """Pure-JAX reference mirroring the PyTorch forward."""
    x_proj = x[:, None] * w[None, :]
    return jnp.concatenate([jnp.sin(x_proj), jnp.cos(x_proj)], axis=-1)


if __name__ == "__main__":
    key = jax.random.PRNGKey(0)

    N = 200            # not a multiple of the tile -> exercises the padding path
    EMBED_DIM = 256    # half = 128 -> lane-dense sin/cos halves and output store

    # Diffusion-time-like inputs in [0, 1).
    x = jax.random.uniform(key, (N,), dtype=jnp.float32)

    model = GaussianFourierProjectionPallas(EMBED_DIM)

    # tm=128 forces a 2-step "parallel" grid (multi-tile + padding + both-TC
    # path on v7x); production use with large N keeps the default tm=2048.
    emb = model(x, tm=128)
    emb = jax.block_until_ready(emb)

    ref = _reference_forward(x, model.W)
    assert emb.shape == (N, EMBED_DIM)
    # sin/cos of arguments up to ~1e4 in f32: allow small range-reduction slack.
    assert jnp.allclose(emb, ref, atol=1e-3, rtol=1e-3), "mismatch vs reference"

    # Also exercise the single-tile (tm >= N) fast path.
    emb1 = jax.block_until_ready(model(x))
    assert jnp.allclose(emb1, ref, atol=1e-3, rtol=1e-3), "mismatch (single tile)"

    print("KERNEL_OK")
</pallas_src>

<mosaic_0001>
module attributes {stable_mosaic.version = 11 : i64} {
  func.func @_gfp_kernel(%arg0: i32, %arg1: memref<128x1xf32, #tpu.memory_space<vmem>>, %arg2: memref<1x128xf32, #tpu.memory_space<vmem>>, %arg3: memref<128x256xf32, #tpu.memory_space<vmem>>) attributes {dimension_semantics = [#tpu.dimension_semantics<parallel>], iteration_bounds = array<i64: 2>, scalar_prefetch = 0 : i64, scratch_operands = 0 : i64, tpu.core_type = #tpu.core_type<tc>, window_params = [{transform_indices = @transform_0, window_bounds = array<i64: 128, 1>}, {pipeline_mode = #tpu.pipeline_mode<synchronous>, transform_indices = @transform_1, window_bounds = array<i64: 1, 128>}, {transform_indices = @transform_2, window_bounds = array<i64: 128, 256>}]} {
    %c0 = arith.constant 0 : index
    %c0_0 = arith.constant 0 : index
    %0 = vector.load %arg1[%c0, %c0_0] : memref<128x1xf32, #tpu.memory_space<vmem>>, vector<128x1xf32>
    %c0_1 = arith.constant 0 : index
    %c0_2 = arith.constant 0 : index
    %1 = vector.load %arg2[%c0_1, %c0_2] : memref<1x128xf32, #tpu.memory_space<vmem>>, vector<1x128xf32>
    %2 = vector.broadcast %0 : vector<128x1xf32> to vector<128x128xf32>
    %3 = vector.broadcast %1 : vector<1x128xf32> to vector<128x128xf32>
    %4 = arith.mulf %2, %3 : vector<128x128xf32>
    %5 = math.sin %4 : vector<128x128xf32>
    %c0_3 = arith.constant 0 : index
    %c0_4 = arith.constant 0 : index
    %6 = vector.load %arg3[%c0_3, %c0_4] : memref<128x256xf32, #tpu.memory_space<vmem>>, vector<128x128xf32>
    tpu.vector_store %arg3[%c0_3, %c0_4], %5 {strides = array<i32>} : memref<128x256xf32, #tpu.memory_space<vmem>>, vector<128x128xf32>,
    %7 = math.cos %4 : vector<128x128xf32>
    %c0_5 = arith.constant 0 : index
    %c128 = arith.constant 128 : index
    %8 = vector.load %arg3[%c0_5, %c128] : memref<128x256xf32, #tpu.memory_space<vmem>>, vector<128x128xf32>
    tpu.vector_store %arg3[%c0_5, %c128], %7 {strides = array<i32>} : memref<128x256xf32, #tpu.memory_space<vmem>>, vector<128x128xf32>,
    return
  }
  func.func @transform_0(%arg0: i32) -> (i32, i32) {
    %c0_i32 = arith.constant 0 : i32
    %c0_i32_0 = arith.constant 0 : i32
    return %arg0, %c0_i32 : i32, i32
  }
  func.func @transform_1(%arg0: i32) -> (i32, i32) {
    %c0_i32 = arith.constant 0 : i32
    %c0_i32_0 = arith.constant 0 : i32
    %c0_i32_1 = arith.constant 0 : i32
    return %c0_i32, %c0_i32_0 : i32, i32
  }
  func.func @transform_2(%arg0: i32) -> (i32, i32) {
    %c0_i32 = arith.constant 0 : i32
    %c0_i32_0 = arith.constant 0 : i32
    return %arg0, %c0_i32 : i32, i32
  }
}

</mosaic_0001>

<bundles_post_ra>
// kernel: tpu_custom_call.1
= control target key start
LH: loop header
LB: loop body
LE: loop exit
PB: predicated region body
PF: predicated region fallthrough
CT: control target
= control target key end

     0   :  { %7 = vsyncpa [#allocation3], 0  ;;  %s5808_s0 = inlined_call_operand.vmem [shape: f32[256,1], index: 0, kind: input, shape index: {}]   ;;  %s5809_s1 = inlined_call_operand.vmem [shape: f32[1,128], index: 1, kind: input, shape index: {}]   ;;  %s5810_s2 = inlined_call_operand.hbm [shape: f32[256,256], index: 2, kind: output, shape index: {}]  }
   0x1   :  { %9 = vsyncpa [#allocation3 + $0x1], 0  ;;  %s4098_s9 = smov 0   ;;  %s4100_s10 = smov 0  }
   0x2   :  { %s4102_s11 = smov 0   ;;  %s4104_s12 = smov 0  }
   0x3 LB: > { %s4119_s13 = sadd.s32 4294967295, %s4071_s12   ;;  %s3685_s14 = sadd.s32 4294967294, %s4071_s12   ;;  %s4071_s12 = sphi %s4104_s12, %s5844_s12   ;;  %s4067_s11 = sphi %s4102_s11, %s5843_s11   ;;  %s4063_s10 = sphi %s4100_s10, %s5842_s10   ;;  %s4059_s9 = sphi %s4098_s9, %s5841_s9  }
   0x4   : > { %s4123_s15 = sadd.s32 1, %s4071_s12   ;;  %s69_s16 = sadd.s32 1, %s4067_s11 }
   0x5   : > { %s66_s17 = ssub.s32 %s4071_s12, %s4123_s15  ;;  %p79_p0 = scmp.ne.s32.totalorder %s4067_s11, %s4063_s10 }
   0x6   : > { %p67_p1 = scmp.eq.s32.totalorder %s66_s17, 0  ;;  %p80_p2 = scmp.eq.s32.totalorder %s4119_s13, 1 }
   0x7   : > { %p85_p3 = scmp.ne.s32.totalorder %s4063_s10, %s4059_s9  ;;  %p86_p4 = scmp.eq.s32.totalorder %s3685_s14, 1 }
   0x8   : > { %s4134_s18 = scalar_select %p67_p1, %s4067_s11, %s69_s16  }
   0x9   : > { %p4136_p5 = por %p80_p2, %p79_p0  ;;  %p4140_p6 = por %p86_p4, %p85_p3 }
   0xa   : > { %p3688_p7 = scmp.ge.s32.totalorder %s4071_s12, 1  ;;  %p116_p8 = scmp.lt.s32.totalorder %s4071_s12, 3 }
   0xc   : > { %p117_p9 = pnand %p3688_p7, %p116_p8 }
   0xd   : > { %s3690_s21 = sshll.u32 (!%p117_p9), %s4119_s13, 4  ;;  %v4073_v0 = vmov (!%p117_p9), 0   ;;  %v4153_v17 = vld [vmem:[%s5809_s1] ss:$0 sm:$0xff] (!%p117_p9)  ;;  %v4074_v52 = vmov (!%p117_p9), 683565275  }
   0xe   : > { %120 = sbr.rel (%p117_p9) target bundleno = 631 (0x277), region = 28  ;;  %3942 = vset.pattern.permute.xlu1 (!%p117_p9), %v4073_v0  ;;  %3941 = vset.pattern.permute.xlu0 (!%p117_p9), %v4073_v0  ;;  %p139_p10 = scmp.lt.s32.totalorder (!%p117_p9), %s3690_s21, 31  ;;  %v4075_v56 = vmov (!%p117_p9), 2475754826   ;;  %v4076_v58 = vmov (!%p117_p9), 2131351028  }
   0xf   : > { %v4077_v60 = vmov (!%p117_p9), 2102212464   ;;  %v4078_v62 = vmov (!%p117_p9), 920167782   ;;  %s135_s28 = sand.u32 (!%p117_p9), 1, %s4063_s10   ;;  %s3828_s7 = sshll.u32 (!%p117_p9), %s4119_s13, 12 }
  0x10   : > { %s4411_s29 = sshll.u32 (!%p117_p9), %s135_s28, 8  ;;  %s5758_s13 = scalar_lea.hbm (!%p117_p9), %s5810_s2, %s3828_s7 }
  0x11   : > { %s4455_s30 = scalar_lea.vmem (!%p117_p9), [#allocation2], %s4411_s29  ;;  %s5767_s17 = scalar_lea.sflag (!%p117_p9), [#allocation3], %s135_s28 }
  0x12   : > { %s3623_s8 = sshll.u32 (!%p117_p9), %s4455_s30, 4  ;;  %s5760_s8 = int_to_ptr.vmem [resolvable:$true] %s3623_s8 }
  0x15   : > { %s5846_s21 = smov (!%p139_p10, %s3690_s21), 31 }
  0x16   : > { %s3691_s22 = sshll.u32 %s5846_s21, 3  ;;  %s4009_s21 = scalar_lea.vmem %s5760_s8, 4096 }
  0x17   : > { %s142_s25 = scalar_lea.vmem %s5808_s0, %s3691_s22  ;;  %p4010_p11 = scmp.ne.s32.totalorder %s5760_s8, %s4009_s21 }
  0x18   : > { %v147_v1 = vld [vmem:[%s142_s25 + $0x10] sm:$0xff]  ;;  %v145_v2 = vld [vmem:[%s142_s25] sm:$0xff]  ;;  %v148_v3 = vld [vmem:[%s142_s25 + $0x18] sm:$0xff]  ;;  %s4080_s22 = smov [#allocation2]  }
  0x19   : > { %174 = vperm.xlu1 %3942, %v147_v1   ;;  %164 = vperm.xlu0 %3941, %v145_v2   ;;  %v146_v4 = vld [vmem:[%s142_s25 + $0x8] sm:$0xff]  ;;  %v149_v6 = vld [vmem:[%s142_s25 + $0x20] sm:$0xff]  ;;  %v152_v7 = vld [vmem:[%s142_s25 + $0x38] sm:$0xff]  ;;  %p4011_p12 = pnand %p4010_p11, %p4136_p5  ;;  %s4013_s23 = sshll.u32 %s4080_s22, 4  ;;  %s4014_s23 = int_to_ptr.vmem [resolvable:$false] %s4013_s23 }
  0x1a   : > { %v150_v5 = vld [vmem:[%s142_s25 + $0x28] sm:$0xff]  ;;  %v151_v8 = vld [vmem:[%s142_s25 + $0x30] sm:$0xff]  ;;  %v153_v10 = vld [vmem:[%s142_s25 + $0x40] sm:$0xff]  ;;  %s4015_s24 = scalar_lea.vmem %s4014_s23, 8192  ;;  %p4016_p0 = scmp.lt.s32.totalorder %s5760_s8, %s4014_s23 }
  0x1b   : > { %v154_v9 = vld [vmem:[%s142_s25 + $0x48] sm:$0xff]  ;;  %v156_v11 = vld [vmem:[%s142_s25 + $0x58] sm:$0xff]  ;;  %v155_v12 = vld [vmem:[%s142_s25 + $0x50] sm:$0xff]  ;;  %p4012_p13 = pneg %p4011_p12  ;;  %p4017_p1 = scmp.lt.s32.totalorder %s4015_s24, %s4009_s21 }
  0x1c   : > { %v158_v13 = vld [vmem:[%s142_s25 + $0x68] sm:$0xff]  ;;  %v157_v14 = vld [vmem:[%s142_s25 + $0x60] sm:$0xff]  ;;  %v160_v15 = vld [vmem:[%s142_s25 + $0x78] sm:$0xff] }
  0x1d   : > { %179 = vperm.xlu1 %3942, %v148_v3   ;;  %169 = vperm.xlu0 %3941, %v146_v4   ;;  %v159_v16 = vld [vmem:[%s142_s25 + $0x70] sm:$0xff]  ;;  %p4018_p2 = por %p4017_p1, %p4016_p0 }
  0x1f   : > { %p4019_p3 = pnand %p4018_p2, %p4012_p13 }
  0x21   : > { %189 = vperm.xlu1 %3942, %v150_v5   ;;  %184 = vperm.xlu0 %3941, %v149_v6   ;;  %v4079_v5 = vmov 1326507024  }
  0x25   : > { %199 = vperm.xlu1 %3942, %v152_v7   ;;  %194 = vperm.xlu0 %3941, %v151_v8  }
  0x29   : > { %209 = vperm.xlu1 %3942, %v154_v9   ;;  %204 = vperm.xlu0 %3941, %v153_v10  }
  0x2d   : > { %219 = vperm.xlu1 %3942, %v156_v11   ;;  %214 = vperm.xlu0 %3941, %v155_v12  }
  0x31   : > { %229 = vperm.xlu1 %3942, %v158_v13   ;;  %224 = vperm.xlu0 %3941, %v157_v14  }
  0x35   : > { %239 = vperm.xlu1 %3942, %v160_v15   ;;  %234 = vperm.xlu0 %3941, %v159_v16  }
  0x98   : > { %v175_v18 = vpop.permute.xlu1 %174  ;;  %v165_v19 = vpop.permute.xlu0 %164 }
  0x99   : > { %v4156_v20 = vmul.f32 %v4153_v17, %v175_v18  ;;  %v4159_v21 = vmul.f32 %v4153_v17, %v165_v19 }
  0x9b   : > { %v472_v22 = vand.u32 2147483647, %v4156_v20  ;;  %v475_v23 = vand.u32 2139095040, %v4156_v20  ;;  %v264_v24 = vand.u32 2147483647, %v4159_v21  ;;  %v267_v25 = vand.u32 2139095040, %v4159_v21 }
  0x9c   : > { %v180_v26 = vpop.permute.xlu1 %179  ;;  %v170_v40 = vpop.permute.xlu0 %169  ;;  %vm474_vm14 = vcmp.lt.s32.totalorder %v4156_v20, 0 }
  0x9d   : > { %v476_v27 = vshrl.u32 %v475_v23, 23  ;;  %v4166_v28 = vmul.f32 %v4153_v17, %v180_v26  ;;  %v479_v29 = vand.u32 8388607, %v472_v22  ;;  %v268_v30 = vshrl.u32 %v267_v25, 23 }
  0x9e   : > { %v271_v31 = vand.u32 8388607, %v264_v24  ;;  %v4174_v46 = vmul.f32 %v4153_v17, %v170_v40  ;;  %vm4257_vm13 = vcmp.le.f32.partialorder %v472_v22, 0.7853982 }
  0x9f   : > { %v3701_v32 = vadd.s32 4294967169, %v476_v27  ;;  %v3693_v33 = vadd.s32 4294967169, %v268_v30  ;;  %v579_v34 = vand.u32 2139095040, %v4166_v28  ;;  %v480_v36 = vor.u32 8388608, %v479_v29 }
  0xa0   : > { %v272_v37 = vor.u32 8388608, %v271_v31  ;;  %v576_v50 = vand.u32 2147483647, %v4166_v28 }
  0xa1   : > { %v482_v35 = vadd.s32 1, %v3701_v32  ;;  %v274_v38 = vadd.s32 1, %v3693_v33  ;;  %v580_v39 = vshrl.u32 %v579_v34, 23  ;;  %v4176_v47 = vshll.u32 %v480_v36, 8 }
  0xa2   : > { %v4180_v49 = vshll.u32 %v272_v37, 8 }
  0xa3   : > { %vm483_vm0 = vcmp.gt.s32.totalorder %v482_v35, 0  ;;  %vm275_vm1 = vcmp.gt.s32.totalorder %v274_v38, 0  ;;  %v3705_v42 = vadd.s32 4294967169, %v580_v39 }
  0xa4   : > { %v484_v41 = vsel %vm483_vm0, %v482_v35, 0  ;;  %v276_v45 = vsel %vm275_vm1, %v274_v38, 0  ;;  %vm266_vm0 = vcmp.lt.s32.totalorder %v4159_v21, 0 }
  0xa5   : > { %v485_v43 = vshrl.u32 %v484_v41, 5  ;;  %v486_v44 = vand.u32 31, %v484_v41  ;;  %v4178_v48 = vshrl.u32 %v276_v45, 5  ;;  %v278_v54 = vand.u32 31, %v276_v45 }
  0xa6   : > { %v4184_v55 = vadd.s32 1, %v3705_v42 }
  0xa7   : > { %v487_v51 = vsub.s32 32, %v486_v44  ;;  %v489_v53 = vshll.u32 %v4074_v52, %v486_v44  ;;  %v492_v57 = vshll.u32 %v4075_v56, %v486_v44  ;;  %v495_v59 = vshll.u32 %v4076_v58, %v486_v44 }
  0xa8   : > { %v498_v61 = vshll.u32 %v4077_v60, %v486_v44  ;;  %v501_v63 = vshll.u32 %v4078_v62, %v486_v44  ;;  %vm504_vm2 = vcmp.lt.s32.totalorder %v485_v43, 1  ;;  %vm505_vm3 = vcmp.lt.s32.totalorder %v485_v43, 2 }
  0xa9   : > { %v490_v0 = vshrl.u32 %v4075_v56, %v487_v51  ;;  %v493_v1 = vshrl.u32 %v4076_v58, %v487_v51  ;;  %v496_v2 = vshrl.u32 %v4077_v60, %v487_v51  ;;  %v488_v3 = vshrl.u32 %v4074_v52, %v487_v51 }
  0xaa   : > { %v499_v4 = vshrl.u32 %v4078_v62, %v487_v51  ;;  %v502_v6 = vshrl.u32 %v4079_v5, %v487_v51  ;;  %v279_v10 = vsub.s32 32, %v278_v54  ;;  %vm506_vm4 = vcmp.lt.s32.totalorder %v485_v43, 3 }
  0xab   : > { %v491_v7 = vor.u32 %v490_v0, %v489_v53  ;;  %v494_v8 = vor.u32 %v493_v1, %v492_v57  ;;  %v497_v9 = vor.u32 %v496_v2, %v495_v59  ;;  %vm507_vm5 = vcmp.lt.s32.totalorder %v485_v43, 4 }
  0xac   : > { %v500_v11 = vor.u32 %v499_v4, %v498_v61  ;;  %v503_v12 = vor.u32 %v502_v6, %v501_v63  ;;  %v281_v25 = vshll.u32 %v4074_v52, %v278_v54  ;;  %v282_v29 = vshrl.u32 %v4075_v56, %v279_v10 }
  0xad   : > { %v508_v13 = vsel %vm504_vm2, %v488_v3, %v491_v7  ;;  %v509_v14 = vsel %vm507_vm5, %v497_v9, 2102212464  ;;  %v512_v15 = vsel %vm504_vm2, %v491_v7, %v494_v8  ;;  %v516_v16 = vsel %vm504_vm2, %v494_v8, %v497_v9 }
  0xae   : > { %v510_v18 = vsel %vm506_vm4, %v494_v8, %v509_v14  ;;  %v513_v19 = vsel %vm507_vm5, %v500_v11, 920167782  ;;  %v517_v23 = vsel %vm507_vm5, %v503_v12, 1326507024  ;;  %v284_v30 = vshll.u32 %v4075_v56, %v278_v54 }
  0xaf   : > { %v514_v26 = vsel %vm506_vm4, %v497_v9, %v513_v19  ;;  %v518_v27 = vsel %vm506_vm4, %v500_v11, %v517_v23  ;;  %v511_v31 = vsel %vm505_vm3, %v508_v13, %v510_v18  ;;  %v285_v34 = vshrl.u32 %v4076_v58, %v279_v10 }
  0xb0   : > { %v515_v32 = vsel %vm505_vm3, %v512_v15, %v514_v26  ;;  %v519_v33 = vsel %vm505_vm3, %v516_v16, %v518_v27  ;;  %v283_v39 = vor.u32 %v282_v29, %v281_v25  ;;  %v287_v41 = vshll.u32 %v4076_v58, %v278_v54 }
  0xb1   : > { %v4207_v35 = vmul.u32.u64.low %v4176_v47, %v519_v33  ;;  %v4208_v36 = vmul.u32.u64.high %v4176_v47, %v519_v33, %v4207_v35  ;;  %v4211_v37 = vmul.u32.u64.low %v4176_v47, %v515_v32  ;;  %v4212_v38 = vmul.u32.u64.high %v4176_v47, %v515_v32, %v4211_v37 }
  0xb2   : > { %v286_v40 = vor.u32 %v285_v34, %v284_v30  ;;  %v288_v42 = vshrl.u32 %v4077_v60, %v279_v10  ;;  %v280_v43 = vshrl.u32 %v4074_v52, %v279_v10  ;;  %v290_v44 = vshll.u32 %v4077_v60, %v278_v54 }
  0xb3   : > { %v291_v45 = vshrl.u32 %v4078_v62, %v279_v10  ;;  %v294_v51 = vshrl.u32 %v4079_v5, %v279_v10  ;;  %v527_v53 = vmul.u32 %v4176_v47, %v511_v31  ;;  %v293_v59 = vshll.u32 %v4078_v62, %v278_v54 }
  0xb4   : > { %v289_v57 = vor.u32 %v288_v42, %v287_v41  ;;  %vm296_vm6 = vcmp.lt.s32.totalorder %v4178_v48, 1  ;;  %vm529_vm7 = vc.u32 %v4208_v36, %v4211_v37  ;;  %v530_v61 = vadd.s32 1, %v4212_v38 }
  0xb5   : > { %v292_v63 = vor.u32 %v291_v45, %v290_v44  ;;  %vm297_vm8 = vcmp.lt.s32.totalorder %v4178_v48, 2  ;;  %v295_v0 = vor.u32 %v294_v51, %v293_v59  ;;  %vm298_vm9 = vcmp.lt.s32.totalorder %v4178_v48, 3 }
  0xb6   : > { %vm299_vm10 = vcmp.lt.s32.totalorder %v4178_v48, 4  ;;  %v304_v1 = vsel %vm296_vm6, %v283_v39, %v286_v40  ;;  %v531_v47 = vsel %vm529_vm7, %v530_v61, %v4212_v38  ;;  %v308_v3 = vsel %vm296_vm6, %v286_v40, %v289_v57 }
  0xb7   : > { %v301_v2 = vsel %vm299_vm10, %v289_v57, 2102212464  ;;  %v305_v54 = vsel %vm299_vm10, %v292_v63, 920167782  ;;  %v532_v4 = vadd.s32 %v531_v47, %v527_v53  ;;  %v300_v6 = vsel %vm296_vm6, %v280_v43, %v283_v39 }
  0xb8   : > { %v306_v7 = vsel %vm298_vm9, %v289_v57, %v305_v54  ;;  %v309_v8 = vsel %vm299_vm10, %v295_v0, 1326507024  ;;  %v302_v9 = vsel %vm298_vm9, %v286_v40, %v301_v2  ;;  %vm587_vm11 = vcmp.gt.s32.totalorder %v4184_v55, 0 }
  0xb9   : > { %v307_v10 = vsel %vm297_vm8, %v304_v1, %v306_v7  ;;  %v310_v11 = vsel %vm298_vm9, %v292_v63, %v309_v8  ;;  %v533_v12 = vadd.s32 536870912, %v532_v4  ;;  %v303_v23 = vsel %vm297_vm8, %v300_v6, %v302_v9 }
  0xba   : > { %v311_v13 = vsel %vm297_vm8, %v308_v3, %v310_v11  ;;  %v4237_v14 = vmul.u32.u64.low %v4180_v49, %v307_v10  ;;  %v4238_v15 = vmul.u32.u64.high %v4180_v49, %v307_v10, %v4237_v14  ;;  %v583_v25 = vand.u32 8388607, %v576_v50 }
  0xbb   : > { %v4241_v16 = vmul.u32.u64.low %v4180_v49, %v311_v13  ;;  %v4242_v18 = vmul.u32.u64.high %v4180_v49, %v311_v13, %v4241_v16  ;;  %v534_v19 = vshrl.u32 %v533_v12, 30  ;;  %v588_v26 = vsel %vm587_vm11, %v4184_v55, 0 }
  0xbc   : > { %v322_v29 = vadd.s32 1, %v4238_v15  ;;  %v371_v30 = vand.u32 2139095040, %v4174_v46  ;;  %v319_v31 = vmul.u32 %v4180_v49, %v303_v23  ;;  %v590_v34 = vand.u32 31, %v588_v26 }
  0xbd   : > { %v535_v27 = vshll.u32 %v534_v19, 30  ;;  %vm321_vm12 = vc.u32 %v4242_v18, %v4237_v14  ;;  %v584_v35 = vor.u32 8388608, %v583_v25  ;;  %v558_v40 = vsub.s32 4, %v534_v19 }
  0xbe   : > { %v323_v33 = vsel %vm321_vm12, %v322_v29, %v4238_v15  ;;  %v372_v39 = vshrl.u32 %v371_v30, 23  ;;  %v368_v55 = vand.u32 2147483647, %v4174_v46  ;;  %v591_v43 = vsub.s32 32, %v590_v34 }
  0xbf   : > { %v536_v32 = vsub.s32 %v532_v4, %v535_v27  ;;  %v324_v48 = vadd.s32 %v323_v33, %v319_v31  ;;  %v4264_v45 = vshll.u32 %v584_v35, 8  ;;  %v528_v51 = vadd.s32 %v4211_v37, %v4208_v36 }
  0xc0   : > { %v4268_v57 = vshrl.u32 %v588_v26, 5  ;;  %v4270_v59 = vadd.s32 4294967169, %v372_v39  ;;  %v559_v22 = vsel %vm474_vm14, %v558_v40, %v534_v19  ;;  %v4275_v61 = vadd.s32 %v4237_v14, %v4242_v18 }
  0xc1   : > { %v538_v38 = vsub.s32 0, %v536_v32  ;;  %v325_v41 = vadd.s32 536870912, %v324_v48  ;;  %v4280_v0 = vand.u32 8388607, %v368_v55  ;;  %v593_v36 = vshll.u32 %v4074_v52, %v590_v34 }
  0xc2   : > { %v594_v37 = vshrl.u32 %v4075_v56, %v591_v43  ;;  %v596_v47 = vshll.u32 %v4075_v56, %v590_v34  ;;  %v597_v54 = vshrl.u32 %v4076_v58, %v591_v43  ;;  %v600_v3 = vshrl.u32 %v4077_v60, %v591_v43 }
  0xc3   : > { %v3702_v42 = vmin.u32 %v538_v38, %v536_v32  ;;  %v4262_v44 = vshrl.u32 %v325_v41, 30  ;;  %v603_v4 = vshrl.u32 %v4078_v62, %v591_v43  ;;  %v4292_v6 = vsel %vm4257_vm13, 0, %v559_v22 }
  0xc4   : > { %v592_v7 = vshrl.u32 %v4074_v52, %v591_v43  ;;  %v606_v8 = vshrl.u32 %v4079_v5, %v591_v43  ;;  %v599_v11 = vshll.u32 %v4076_v58, %v590_v34  ;;  %v602_v12 = vshll.u32 %v4077_v60, %v590_v34 }
  0xc5   : > { %v540_v53 = vclz %v3702_v42  ;;  %v327_v63 = vshll.u32 %v4262_v44, 30  ;;  %v595_v15 = vor.u32 %v594_v37, %v593_v36  ;;  %v605_v16 = vshll.u32 %v4078_v62, %v590_v34 }
  0xc6   : > { %v598_v19 = vor.u32 %v597_v54, %v596_v47  ;;  %v601_v23 = vor.u32 %v600_v3, %v599_v11  ;;  %v604_v25 = vor.u32 %v603_v4, %v602_v12  ;;  %v350_v33 = vsub.s32 4, %v4262_v44 }
  0xc7   : > { %v3703_v1 = vadd.s32 4294967294, %v540_v53  ;;  %v4285_v2 = vsub.s32 %v324_v48, %v327_v63  ;;  %v607_v30 = vor.u32 %v606_v8, %v605_v16  ;;  %vm608_vm1 = vcmp.lt.s32.totalorder %v4268_v57, 1 }
  0xc8   : > { %vm609_vm2 = vcmp.lt.s32.totalorder %v4268_v57, 2  ;;  %vm610_vm3 = vcmp.lt.s32.totalorder %v4268_v57, 3  ;;  %vm611_vm4 = vcmp.lt.s32.totalorder %v4268_v57, 4  ;;  %v620_v39 = vsel %vm608_vm1, %v598_v19, %v601_v23 }
  0xc9   : > { %vm3704_vm15 = vcmp.lt.s32.totalorder %v3703_v1, 0  ;;  %v330_v10 = vsub.s32 0, %v4285_v2  ;;  %v617_v38 = vsel %vm611_vm4, %v604_v25, 920167782  ;;  %vm4313_vm5 = vcmp.le.f32.partialorder %v264_v24, 0.7853982 }
  0xca   : > { %v543_v9 = vsel %vm3704_vm15, 0, %v3703_v1  ;;  %v613_v42 = vsel %vm611_vm4, %v601_v23, 2102212464  ;;  %v618_v43 = vsel %vm610_vm3, %v601_v23, %v617_v38  ;;  %v612_v22 = vsel %vm608_vm1, %v592_v7, %v595_v15 }
  0xcb   : > { %v544_v13 = vsub.s32 32, %v543_v9  ;;  %v548_v14 = vsub.s32 4294967266, %v543_v9  ;;  %v3694_v18 = vmin.u32 %v330_v10, %v4285_v2  ;;  %v545_v26 = vshll.u32 %v536_v32, %v543_v9 }
  0xcc   : > { %v616_v32 = vsel %vm608_vm1, %v595_v15, %v598_v19  ;;  %v614_v3 = vsel %vm610_vm3, %v598_v19, %v613_v42  ;;  %v378_v4 = vadd.s32 1, %v4270_v59  ;;  %v190_v15 = vpop.permute.xlu1 %189  ;;  %v351_v59 = vsel %vm266_vm0, %v350_v33, %v4262_v44 }
  0xcd   : > { %v546_v27 = vshrl.u32 %v528_v51, %v544_v13  ;;  %v549_v29 = vadd.s32 127, %v548_v14  ;;  %v332_v31 = vclz %v3694_v18  ;;  %v621_v51 = vsel %vm611_vm4, %v607_v30, 1326507024 }
  0xce   : > { %v622_v63 = vsel %vm610_vm3, %v604_v25, %v621_v51  ;;  %v619_v24 = vsel %vm609_vm2, %v616_v32, %v618_v43  ;;  %v565_v18 = vadd.s32 3, %v4292_v6  ;;  %vm379_vm7 = vcmp.gt.s32.totalorder %v378_v4, 0 }
  0xcf   : > { %v547_v48 = vor.u32 %v546_v27, %v545_v26  ;;  %v550_v34 = vshll.u32 %v549_v29, 23  ;;  %v3695_v35 = vadd.s32 4294967294, %v332_v31  ;;  %v623_v37 = vsel %vm609_vm2, %v620_v39, %v622_v63 }
  0xd0   : > { %v4332_v9 = vmul.u32.u64.low %v4264_v45, %v623_v37  ;;  %v4333_v10 = vmul.u32.u64.high %v4264_v45, %v623_v37, %v4332_v9  ;;  %v4337_v13 = vmul.u32.u64.low %v4264_v45, %v619_v24  ;;  %v4338_v14 = vmul.u32.u64.high %v4264_v45, %v619_v24, %v4337_v13 }
  0xd1   : > { %v551_v40 = vor.u32 4788187, %v550_v34  ;;  %v554_v53 = vcvt.s32.f32 %v547_v48  ;;  %vm3696_vm6 = vcmp.lt.s32.totalorder %v3695_v35, 0  ;;  %v380_v23 = vsel %vm379_vm7, %v378_v4, 0 }
  0xd2   : > { %v335_v36 = vsel %vm3696_vm6, 0, %v3695_v35  ;;  %v4350_v26 = vand.u32 3, %v4292_v6  ;;  %vm633_vm8 = vc.u32 %v4333_v10, %v4337_v13  ;;  %v4355_v27 = vmul.f32 %v4153_v17, %v190_v15 }
  0xd3   : > { %v552_v1 = vand.u32 2147483647, %v551_v40  ;;  %v336_v47 = vsub.s32 32, %v335_v36  ;;  %v340_v54 = vsub.s32 4294967266, %v335_v36  ;;  %v337_v7 = vshll.u32 %v4285_v2, %v335_v36 }
  0xd4   : > { %v353_v57 = vsel %vm4313_vm5, 0, %v351_v59  ;;  %v634_v30 = vadd.s32 1, %v4338_v14  ;;  %v4363_v31 = vand.u32 3, %v565_v18  ;;  %v382_v33 = vand.u32 31, %v380_v23 }
  0xd5   : > { %v555_v8 = vmul.f32 %v554_v53, %v552_v1  ;;  %v338_v11 = vshrl.u32 %v4275_v61, %v336_v47  ;;  %v341_v12 = vadd.s32 127, %v340_v54  ;;  %v615_v61 = vsel %vm609_vm2, %v612_v22, %v614_v3 }
  0xd6   : > { %v631_v6 = vmul.u32 %v4264_v45, %v615_v61  ;;  %v635_v35 = vsel %vm633_vm8, %v634_v30, %v4338_v14  ;;  %v357_v32 = vadd.s32 3, %v353_v57  ;;  %v376_v38 = vor.u32 8388608, %v4280_v0 }
  0xd7   : > { %v556_v16 = vxor.u32 2147483648, %v555_v8  ;;  %v339_v2 = vor.u32 %v338_v11, %v337_v7  ;;  %v342_v19 = vshll.u32 %v341_v12, 23  ;;  %v383_v39 = vsub.s32 32, %v382_v33 }
  0xd8   : > { %v636_v49 = vadd.s32 %v635_v35, %v631_v6  ;;  %v4368_v42 = vand.u32 3, %v353_v57  ;;  %v4370_v43 = vshrl.u32 %v380_v23, 5  ;;  %v385_v51 = vshll.u32 %v4074_v52, %v382_v33 }
  0xd9   : > { %v557_v25 = vsel %vm474_vm14, %v556_v16, %v555_v8  ;;  %v343_v29 = vor.u32 4788187, %v342_v19  ;;  %v346_v34 = vcvt.s32.f32 %v339_v2  ;;  %vm571_vm9 = vcmp.eq.s32.totalorder %v4363_v31, 2 }
  0xda   : > { %v560_v44 = vsel %vm4257_vm13, %v4156_v20, %v557_v25  ;;  %vm2248_vm10 = vcmp.eq.s32.totalorder %v4350_v26, 2  ;;  %v637_v45 = vadd.s32 536870912, %v636_v49  ;;  %v386_v53 = vshrl.u32 %v4075_v56, %v383_v39 }
  0xdb   : > { %3943 = vcosq.f32 %v560_v44  ;;  %v344_v48 = vand.u32 2147483647, %v343_v29  ;;  %v389_v22 = vshrl.u32 %v4076_v58, %v383_v39  ;;  %v391_v63 = vshll.u32 %v4076_v58, %v382_v33 }
  0xdc   : > { %3945 = vsinq.f32 %v560_v44  ;;  %vm568_vm11 = vcmp.eq.s32.totalorder %v4363_v31, 0  ;;  %vm2245_vm12 = vcmp.eq.s32.totalorder %v4350_v26, 0  ;;  %v392_v1 = vshrl.u32 %v4077_v60, %v383_v39 }
  0xdd   : > { %v347_v40 = vmul.f32 %v346_v34, %v344_v48  ;;  %v394_v36 = vshll.u32 %v4077_v60, %v382_v33  ;;  %v395_v24 = vshrl.u32 %v4078_v62, %v383_v39  ;;  %vm567_vm13 = vcmp.lt.s32.totalorder %v4363_v31, 2 }
  0xde   : > { %vm2244_vm14 = vcmp.lt.s32.totalorder %v4350_v26, 2  ;;  %v4385_v37 = vand.u32 3, %v357_v32  ;;  %v4387_v47 = vshrl.u32 %v637_v45, 30  ;;  %v388_v54 = vshll.u32 %v4075_v56, %v382_v33 }
  0xdf   : > { %v348_v0 = vxor.u32 2147483648, %v347_v40  ;;  %v4390_v3 = vshll.u32 %v376_v38, 8  ;;  %vm564_vm15 = vweird.f32 %v4156_v20  ;;  %v387_v8 = vor.u32 %v386_v53, %v385_v51 }
  0xe0   : > { %v393_v7 = vor.u32 %v392_v1, %v391_v63  ;;  %v396_v9 = vor.u32 %v395_v24, %v394_v36  ;;  %v639_v12 = vshll.u32 %v4387_v47, 30  ;;  %v390_v14 = vor.u32 %v389_v22, %v388_v54 }
  0xe1   : > { %v349_v4 = vsel %vm266_vm0, %v348_v0, %v347_v40  ;;  %vm403_vm1 = vcmp.lt.s32.totalorder %v4370_v43, 4  ;;  %v398_v15 = vshrl.u32 %v4079_v5, %v383_v39  ;;  %vm400_vm2 = vcmp.lt.s32.totalorder %v4370_v43, 1 }
  0xe2   : > { %v352_v11 = vsel %vm4313_vm5, %v4159_v21, %v349_v4  ;;  %v409_v16 = vsel %vm403_vm1, %v396_v9, 920167782  ;;  %v4405_v59 = vsub.s32 %v636_v49, %v639_v12  ;;  %vm401_vm0 = vcmp.lt.s32.totalorder %v4370_v43, 2 }
  0xe3   : > { %3947 = vcosq.f32 %v352_v11  ;;  %vm402_vm3 = vcmp.lt.s32.totalorder %v4370_v43, 3  ;;  %v384_v19 = vshrl.u32 %v4074_v52, %v383_v39  ;;  %v397_v61 = vshll.u32 %v4078_v62, %v382_v33 }
  0xe4   : > { %3949 = vsinq.f32 %v352_v11  ;;  %v405_v23 = vsel %vm403_vm1, %v393_v7, 2102212464  ;;  %vm578_vm4 = vcmp.lt.s32.totalorder %v4166_v28, 0  ;;  %v642_v44 = vsub.s32 0, %v4405_v59 }
  0xe5   : > { %v3944_v18 = vpop.eup %3943  ;;  %v408_v29 = vsel %vm400_vm2, %v387_v8, %v390_v14  ;;  %v410_v57 = vsel %vm402_vm3, %v393_v7, %v409_v16  ;;  %vm2042_vm5 = vcmp.eq.s32.totalorder %v4368_v42, 2  ;;  %v399_v33 = vor.u32 %v398_v15, %v397_v61 }
  0xe6   : > { %v3946_v41 = vpop.eup %3945  ;;  %v572_v2 = vxor.u32 2147483648, %v3944_v18  ;;  %v404_v48 = vsel %vm400_vm2, %v384_v19, %v387_v8  ;;  %vm2039_vm6 = vcmp.eq.s32.totalorder %v4368_v42, 0  ;;  %v3706_v32 = vmin.u32 %v642_v44, %v4405_v59 }
  0xe7   : > { %v569_v25 = vxor.u32 2147483648, %v3946_v41  ;;  %v406_v49 = vsel %vm402_vm3, %v390_v14, %v405_v23  ;;  %vm359_vm7 = vcmp.lt.s32.totalorder %v4385_v37, 2  ;;  %vm2038_vm8 = vcmp.lt.s32.totalorder %v4368_v42, 2 }
  0xe8   : > { %v573_v30 = vsel %vm571_vm9, %v572_v2, %v3946_v41  ;;  %v2250_v6 = vsel %vm2248_vm10, %v572_v2, %v3946_v41  ;;  %v411_v40 = vsel %vm401_vm0, %v408_v29, %v410_v57  ;;  %v787_v51 = vand.u32 2139095040, %v4355_v27 }
  0xe9   : > { %v570_v34 = vsel %vm568_vm11, %v3944_v18, %v569_v25  ;;  %v2247_v35 = vsel %vm2245_vm12, %v3944_v18, %v569_v25  ;;  %vm356_vm9 = vweird.f32 %v4159_v21  ;;  %v644_v31 = vclz %v3706_v32 }
  0xea   : > { %v574_v38 = vsel %vm567_vm13, %v570_v34, %v573_v30  ;;  %v2251_v39 = vsel %vm2244_vm14, %v2247_v35, %v2250_v6  ;;  %v412_v26 = vsel %vm400_vm2, %v390_v14, %v393_v7  ;;  %vm360_vm10 = vcmp.eq.s32.totalorder %v4385_v37, 0 }
  0xeb   : > { %v575_v45 = vsel %vm564_vm15, nan, %v574_v38  ;;  %v2252_v53 = vsel %vm564_vm15, nan, %v2251_v39  ;;  %v662_v22 = vsub.s32 4, %v4387_v47  ;;  %v407_v20 = vsel %vm401_vm0, %v404_v48, %v406_v49 }
  0xec   : > { %1930 = vst [vmem:[%s4455_s30 + $0x20] sm:$0xff] %v575_v45  ;;  %3594 = vst [vmem:[%s4455_s30 + $0x28] sm:$0xff] %v2252_v53  ;;  %v413_v63 = vsel %vm403_vm1, %v399_v33, 1326507024  ;;  %v3707_v0 = vadd.s32 4294967294, %v644_v31  ;;  %v4468_v36 = vmul.u32.u64.low %v4390_v3, %v411_v40  ;;  %v4469_v24 = vmul.u32.u64.high %v4390_v3, %v411_v40, %v4468_v36 }
  0xed   : > { %v414_v1 = vsel %vm402_vm3, %v396_v9, %v413_v63  ;;  %v3948_v54 = vpop.eup %3947  ;;  %vm363_vm11 = vcmp.eq.s32.totalorder %v4385_v37, 2  ;;  %v632_v4 = vadd.s32 %v4337_v13, %v4333_v10  ;;  %v788_v7 = vshrl.u32 %v787_v51, 23  ;;  %v185_v51 = vpop.permute.xlu0 %184 }
  0xee   : > { %v415_v8 = vsel %vm401_vm0, %v412_v26, %v414_v1  ;;  %v3950_v11 = vpop.eup %3949  ;;  %v364_v12 = vxor.u32 2147483648, %v3948_v54  ;;  %vm3708_vm12 = vcmp.lt.s32.totalorder %v3707_v0, 0  ;;  %v663_v18 = vsel %vm578_vm4, %v662_v22, %v4387_v47 }
  0xef   : > { %v4478_v9 = vmul.u32.u64.low %v4390_v3, %v415_v8  ;;  %v4479_v14 = vmul.u32.u64.high %v4390_v3, %v415_v8, %v4478_v9  ;;  %v361_v15 = vxor.u32 2147483648, %v3950_v11  ;;  %v647_v16 = vsel %vm3708_vm12, 0, %v3707_v0 }
  0xf0   : > { %v423_v41 = vmul.u32 %v4390_v3, %v407_v20  ;;  %v365_v10 = vsel %vm363_vm11, %v364_v12, %v3950_v11  ;;  %v2044_v13 = vsel %vm2042_vm5, %v364_v12, %v3950_v11  ;;  %v648_v43 = vsub.s32 32, %v647_v16 }
  0xf1   : > { %v3713_v2 = vadd.s32 4294967169, %v788_v7  ;;  %v362_v19 = vsel %vm360_vm10, %v3948_v54, %v361_v15  ;;  %v2041_v61 = vsel %vm2039_vm6, %v3948_v54, %v361_v15  ;;  %v652_v23 = vsub.s32 4294967266, %v647_v16 }
  0xf2   : > { %v426_v25 = vadd.s32 1, %v4469_v24  ;;  %v366_v47 = vsel %vm359_vm7, %v362_v19, %v365_v10  ;;  %v2045_v3 = vsel %vm2038_vm8, %v2041_v61, %v2044_v13  ;;  %v649_v44 = vshll.u32 %v4405_v59, %v647_v16 }
  0xf3   : > { %v650_v29 = vshrl.u32 %v632_v4, %v648_v43  ;;  %v367_v57 = vsel %vm356_vm9, nan, %v366_v47  ;;  %v2046_v30 = vsel %vm356_vm9, nan, %v2045_v3  ;;  %v653_v6 = vadd.s32 127, %v652_v23 }
  0xf4   : > { %vm425_vm13 = vc.u32 %v4479_v14, %v4468_v36  ;;  %1928 = vst [vmem:[%s4455_s30] sm:$0xff] %v367_v57  ;;  %3592 = vst [vmem:[%s4455_s30 + $0x8] sm:$0xff] %v2046_v30  ;;  %vm4507_vm14 = vcmp.le.f32.partialorder %v576_v50, 0.7853982  ;;  %v784_v59 = vand.u32 2147483647, %v4355_v27  ;;  %v794_v33 = vadd.s32 1, %v3713_v2 }
  0xf5   : > { %v427_v37 = vsel %vm425_vm13, %v426_v25, %v4469_v24  ;;  %v651_v48 = vor.u32 %v650_v29, %v649_v44  ;;  %v654_v21 = vshll.u32 %v653_v6, 23  ;;  %v665_v34 = vsel %vm4507_vm14, 0, %v663_v18 }
  0xf6   : > { %v428_v35 = vadd.s32 %v427_v37, %v423_v41  ;;  %vm795_vm15 = vcmp.gt.s32.totalorder %v794_v33, 0  ;;  %v669_v39 = vadd.s32 3, %v665_v34  ;;  %v791_v50 = vand.u32 8388607, %v784_v59 }
  0xf7   : > { %v655_v32 = vor.u32 4788187, %v654_v21  ;;  %v796_v38 = vsel %vm795_vm15, %v794_v33, 0  ;;  %v658_v53 = vcvt.s32.f32 %v651_v48  ;;  %v4517_v20 = vand.u32 3, %v665_v34 }
  0xf8   : > { %v429_v49 = vadd.s32 536870912, %v428_v35  ;;  %v798_v40 = vand.u32 31, %v796_v38  ;;  %vm370_vm1 = vcmp.lt.s32.totalorder %v4174_v46, 0  ;;  %v4521_v0 = vmul.f32 %v4153_v17, %v185_v51 }
  0xf9   : > { %v656_v45 = vand.u32 2147483647, %v655_v32  ;;  %v4523_v1 = vand.u32 3, %v669_v39  ;;  %v792_v24 = vor.u32 8388608, %v791_v50  ;;  %v797_v54 = vshrl.u32 %v796_v38, 5 }
  0xfa   : > { %v430_v31 = vshrl.u32 %v429_v49, 30  ;;  %v799_v26 = vsub.s32 32, %v798_v40  ;;  %v801_v9 = vshll.u32 %v4074_v52, %v798_v40  ;;  %v804_v15 = vshll.u32 %v4075_v56, %v798_v40 }
  0xfb   : > { %v659_v22 = vmul.f32 %v658_v53, %v656_v45  ;;  %v807_v16 = vshll.u32 %v4076_v58, %v798_v40  ;;  %vm4538_vm2 = vcmp.le.f32.partialorder %v368_v55, 0.7853982  ;;  %v810_v2 = vshll.u32 %v4077_v60, %v798_v40 }
  0xfc   : > { %v431_v63 = vshll.u32 %v430_v31, 30  ;;  %v802_v4 = vshrl.u32 %v4075_v56, %v799_v26  ;;  %v805_v11 = vshrl.u32 %v4076_v58, %v799_v26  ;;  %v808_v12 = vshrl.u32 %v4077_v60, %v799_v26 }
  0xfd   : > { %v660_v8 = vxor.u32 2147483648, %v659_v22  ;;  %v811_v18 = vshrl.u32 %v4078_v62, %v799_v26  ;;  %v454_v43 = vsub.s32 4, %v430_v31  ;;  %v813_v23 = vshll.u32 %v4078_v62, %v798_v40 }
  0xfe   : > { %v4526_v7 = vsub.s32 %v428_v35, %v431_v63  ;;  %v803_v61 = vor.u32 %v802_v4, %v801_v9  ;;  %v814_v25 = vshrl.u32 %v4079_v5, %v799_v26  ;;  %v806_v47 = vor.u32 %v805_v11, %v804_v15 }
  0xff   : > { %v661_v41 = vsel %vm578_vm4, %v660_v8, %v659_v22  ;;  %v809_v3 = vor.u32 %v808_v12, %v807_v16  ;;  %v424_v44 = vadd.s32 %v4468_v36, %v4479_v14  ;;  %v812_v29 = vor.u32 %v811_v18, %v810_v2 }
 0x100   : > { %v434_v13 = vsub.s32 0, %v4526_v7  ;;  %v664_v19 = vsel %vm4507_vm14, %v4166_v28, %v661_v41  ;;  %v815_v57 = vor.u32 %v814_v25, %v813_v23  ;;  %v800_v6 = vshrl.u32 %v4074_v52, %v799_v26 }
 0x101   : > { %3951 = vcosq.f32 %v664_v19  ;;  %v4553_v42 = vshll.u32 %v792_v24, 8  ;;  %v683_v37 = vand.u32 2139095040, %v4521_v0  ;;  %v455_v33 = vsel %vm370_vm1, %v454_v43, %v430_v31 }
 0x102   : > { %v3698_v55 = vmin.u32 %v434_v13, %v4526_v7  ;;  %3953 = vsinq.f32 %v664_v19  ;;  %vm816_vm0 = vcmp.lt.s32.totalorder %v797_v54, 1  ;;  %vm818_vm3 = vcmp.lt.s32.totalorder %v797_v54, 3 }
 0x103   : > { %vm819_vm4 = vcmp.lt.s32.totalorder %v797_v54, 4  ;;  %vm675_vm5 = vcmp.eq.s32.totalorder %v4523_v1, 2  ;;  %v820_v21 = vsel %vm816_vm0, %v800_v6, %v803_v61  ;;  %v824_v14 = vsel %vm816_vm0, %v803_v61, %v806_v47 }
 0x104   : > { %v436_v30 = vclz %v3698_v55  ;;  %v821_v36 = vsel %vm819_vm4, %v809_v3, 2102212464  ;;  %vm672_vm6 = vcmp.eq.s32.totalorder %v4523_v1, 0  ;;  %vm2348_vm7 = vcmp.eq.s32.totalorder %v4517_v20, 0 }
 0x105   : > { %v822_v34 = vsel %vm818_vm3, %v806_v47, %v821_v36  ;;  %v825_v35 = vsel %vm819_vm4, %v812_v29, 920167782  ;;  %v828_v32 = vsel %vm816_vm0, %v806_v47, %v809_v3  ;;  %v829_v49 = vsel %vm819_vm4, %v815_v57, 1326507024 }
 0x106   : > { %v3699_v48 = vadd.s32 4294967294, %v436_v30  ;;  %vm671_vm8 = vcmp.lt.s32.totalorder %v4523_v1, 2  ;;  %vm2347_vm9 = vcmp.lt.s32.totalorder %v4517_v20, 2  ;;  %vm817_vm11 = vcmp.lt.s32.totalorder %v797_v54, 2 }
 0x107   : > { %v826_v38 = vsel %vm818_vm3, %v809_v3, %v825_v35  ;;  %v830_v39 = vsel %vm818_vm3, %v812_v29, %v829_v49  ;;  %vm668_vm12 = vweird.f32 %v4166_v28  ;;  %v457_v40 = vsel %vm4538_vm2, 0, %v455_v33 }
 0x108   : > { %vm3700_vm10 = vcmp.lt.s32.totalorder %v3699_v48, 0  ;;  %v827_v51 = vsel %vm817_vm11, %v824_v14, %v826_v38  ;;  %v831_v45 = vsel %vm817_vm11, %v828_v32, %v830_v39  ;;  %v823_v26 = vsel %vm817_vm11, %v820_v21, %v822_v34 }
 0x109   : > { %v439_v50 = vsel %vm3700_vm10, 0, %v3699_v48  ;;  %v684_v22 = vshrl.u32 %v683_v37, 23  ;;  %v4570_v63 = vmul.u32.u64.low %v4553_v42, %v831_v45  ;;  %v4571_v24 = vmul.u32.u64.high %v4553_v42, %v831_v45, %v4570_v63  ;;  %v200_v48 = vpop.permute.xlu1 %199 }
 0x10a   : > { %v440_v53 = vsub.s32 32, %v439_v50  ;;  %v444_v31 = vsub.s32 4294967266, %v439_v50  ;;  %v4574_v4 = vmul.u32.u64.low %v4553_v42, %v827_v51  ;;  %v4575_v54 = vmul.u32.u64.high %v4553_v42, %v827_v51, %v4574_v4 }
 0x10b   : > { %v3952_v8 = vpop.eup %3951  ;;  %v441_v11 = vshll.u32 %v4526_v7, %v439_v50  ;;  %v3709_v15 = vadd.s32 4294967169, %v684_v22  ;;  %vm2351_vm13 = vcmp.eq.s32.totalorder %v4517_v20, 2  ;;  %v461_v41 = vadd.s32 3, %v457_v40 }
 0x10c   : > { %v442_v12 = vshrl.u32 %v424_v44, %v440_v53  ;;  %v445_v9 = vadd.s32 127, %v444_v31  ;;  %v3954_v16 = vpop.eup %3953  ;;  %v676_v18 = vxor.u32 2147483648, %v3952_v8  ;;  %v680_v13 = vand.u32 2147483647, %v4521_v0 }
 0x10d   : > { %v673_v43 = vxor.u32 2147483648, %v3954_v16  ;;  %v690_v61 = vadd.s32 1, %v3709_v15  ;;  %v839_v7 = vmul.u32 %v4553_v42, %v823_v26  ;;  %vm841_vm14 = vc.u32 %v4571_v24, %v4574_v4 }
 0x10e   : > { %v443_v2 = vor.u32 %v442_v12, %v441_v11  ;;  %v446_v19 = vshll.u32 %v445_v9, 23  ;;  %v677_v23 = vsel %vm675_vm5, %v676_v18, %v3954_v16  ;;  %v2353_v25 = vsel %vm2351_vm13, %v676_v18, %v3954_v16 }
 0x10f   : > { %v674_v55 = vsel %vm672_vm6, %v3952_v8, %v673_v43  ;;  %v2350_v47 = vsel %vm2348_vm7, %v3952_v8, %v673_v43  ;;  %v842_v30 = vadd.s32 1, %v4575_v54  ;;  %vm691_vm15 = vcmp.gt.s32.totalorder %v690_v61, 0 }
 0x110   : > { %v447_v3 = vor.u32 4788187, %v446_v19  ;;  %v450_v44 = vcvt.s32.f32 %v443_v2  ;;  %v678_v29 = vsel %vm671_vm8, %v674_v55, %v677_v23  ;;  %v2354_v57 = vsel %vm2347_vm9, %v2350_v47, %v2353_v25 }
 0x111   : > { %v679_v6 = vsel %vm668_vm12, nan, %v678_v29  ;;  %v2355_v42 = vsel %vm668_vm12, nan, %v2354_v57  ;;  %v692_v33 = vsel %vm691_vm15, %v690_v61, 0  ;;  %v843_v20 = vsel %vm841_vm14, %v842_v30, %v4575_v54 }
 0x112   : > { %v448_v37 = vand.u32 2147483647, %v447_v3  ;;  %1931 = vst [vmem:[%s4455_s30 + $0x30] sm:$0xff] %v679_v6  ;;  %3595 = vst [vmem:[%s4455_s30 + $0x38] sm:$0xff] %v2355_v42  ;;  %v694_v1 = vand.u32 31, %v692_v33  ;;  %v844_v36 = vadd.s32 %v843_v20, %v839_v7  ;;  %v4608_v28 = vmul.f32 %v4153_v17, %v200_v48 }
 0x113   : > { %v687_v14 = vand.u32 8388607, %v680_v13  ;;  %v4610_v32 = vand.u32 3, %v461_v41  ;;  %v4612_v49 = vand.u32 3, %v457_v40  ;;  %v4614_v39 = vshrl.u32 %v692_v33, 5 }
 0x114   : > { %v451_v21 = vmul.f32 %v450_v44, %v448_v37  ;;  %v695_v34 = vsub.s32 32, %v694_v1  ;;  %v845_v38 = vadd.s32 536870912, %v844_v36  ;;  %v697_v22 = vshll.u32 %v4074_v52, %v694_v1 }
 0x115   : > { %v706_v63 = vshll.u32 %v4077_v60, %v694_v1  ;;  %v709_v54 = vshll.u32 %v4078_v62, %v694_v1  ;;  %v700_v11 = vshll.u32 %v4075_v56, %v694_v1  ;;  %v703_v12 = vshll.u32 %v4076_v58, %v694_v1 }
 0x116   : > { %v452_v35 = vxor.u32 2147483648, %v451_v21  ;;  %v698_v50 = vshrl.u32 %v4075_v56, %v695_v34  ;;  %v701_v51 = vshrl.u32 %v4076_v58, %v695_v34  ;;  %v704_v45 = vshrl.u32 %v4077_v60, %v695_v34 }
 0x117   : > { %v4621_v31 = vshrl.u32 %v845_v38, 30  ;;  %v707_v17 = vshrl.u32 %v4078_v62, %v695_v34  ;;  %v710_v26 = vshrl.u32 %v4079_v5, %v695_v34  ;;  %v995_v16 = vand.u32 2139095040, %v4608_v28 }
 0x118   : > { %v453_v53 = vsel %vm370_vm1, %v452_v35, %v451_v21  ;;  %v699_v18 = vor.u32 %v698_v50, %v697_v22  ;;  %v702_v41 = vor.u32 %v701_v51, %v700_v11  ;;  %v705_v43 = vor.u32 %v704_v45, %v703_v12 }
 0x119   : > { %v456_v40 = vsel %vm4538_vm2, %v4174_v46, %v453_v53  ;;  %v847_v8 = vshll.u32 %v4621_v31, 30  ;;  %v708_v9 = vor.u32 %v707_v17, %v706_v63  ;;  %v711_v15 = vor.u32 %v710_v26, %v709_v54 }
 0x11a   : > { %3955 = vcosq.f32 %v456_v40  ;;  %vm2145_vm1 = vcmp.eq.s32.totalorder %v4612_v49, 2  ;;  %v688_v19 = vor.u32 8388608, %v687_v14  ;;  %vm715_vm2 = vcmp.lt.s32.totalorder %v4614_v39, 4 }
 0x11b   : > { %3957 = vsinq.f32 %v456_v40  ;;  %v4635_v10 = vsub.s32 %v844_v36, %v847_v8  ;;  %vm2142_vm0 = vcmp.eq.s32.totalorder %v4612_v49, 0  ;;  %vm786_vm3 = vcmp.lt.s32.totalorder %v4355_v27, 0 }
 0x11c   : > { %vm712_vm4 = vcmp.lt.s32.totalorder %v4614_v39, 1  ;;  %v721_v61 = vsel %vm715_vm2, %v708_v9, 920167782  ;;  %v725_v23 = vsel %vm715_vm2, %v711_v15, 1326507024  ;;  %v996_v25 = vshrl.u32 %v995_v16, 23 }
 0x11d   : > { %v850_v2 = vsub.s32 0, %v4635_v10  ;;  %vm463_vm5 = vcmp.lt.s32.totalorder %v4610_v32, 2  ;;  %vm2141_vm6 = vcmp.lt.s32.totalorder %v4612_v49, 2  ;;  %vm714_vm7 = vcmp.lt.s32.totalorder %v4614_v39, 3 }
 0x11e   : > { %v720_v55 = vsel %vm712_vm4, %v699_v18, %v702_v41  ;;  %v724_v47 = vsel %vm712_vm4, %v702_v41, %v705_v43  ;;  %vm460_vm8 = vweird.f32 %v4174_v46  ;;  %vm464_vm9 = vcmp.eq.s32.totalorder %v4610_v32, 0 }
 0x11f   : > { %v3714_v7 = vmin.u32 %v850_v2, %v4635_v10  ;;  %vm467_vm10 = vcmp.eq.s32.totalorder %v4610_v32, 2  ;;  %v722_v3 = vsel %vm714_vm7, %v705_v43, %v721_v61  ;;  %v726_v44 = vsel %vm714_vm7, %v708_v9, %v725_v23  ;;  %v195_v2 = vpop.permute.xlu0 %194 }
 0x120   : > { %v696_v57 = vshrl.u32 %v4074_v52, %v695_v34  ;;  %vm713_vm11 = vcmp.lt.s32.totalorder %v4614_v39, 2  ;;  %v728_v30 = vshll.u32 %v688_v19, 8  ;;  %v717_v6 = vsel %vm715_vm2, %v705_v43, 2102212464 }
 0x121   : > { %v852_v29 = vclz %v3714_v7  ;;  %v723_v42 = vsel %vm713_vm11, %v720_v55, %v722_v3  ;;  %v727_v37 = vsel %vm713_vm11, %v724_v47, %v726_v44  ;;  %v3721_v33 = vadd.s32 4294967169, %v996_v25 }
 0x122   : > { %v870_v1 = vsub.s32 4, %v4621_v31  ;;  %v4671_v21 = vmul.u32.u64.low %v728_v30, %v727_v37  ;;  %v4672_v36 = vmul.u32.u64.high %v728_v30, %v727_v37, %v4671_v21  ;;  %v840_v35 = vadd.s32 %v4574_v4, %v4571_v24 }
 0x123   : > { %v3715_v20 = vadd.s32 4294967294, %v852_v29  ;;  %v4676_v38 = vmul.u32.u64.low %v728_v30, %v723_v42  ;;  %v4677_v50 = vmul.u32.u64.high %v728_v30, %v723_v42, %v4676_v38  ;;  %v716_v45 = vsel %vm712_vm4, %v696_v57, %v699_v18 }
 0x124   : > { %v3956_v48 = vpop.eup %3955  ;;  %v718_v53 = vsel %vm714_vm7, %v702_v41, %v717_v6  ;;  %v1002_v4 = vadd.s32 1, %v3721_v33  ;;  %v871_v54 = vsel %vm786_vm3, %v870_v1, %v4621_v31  ;;  %vm4713_vm15 = vcmp.le.f32.partialorder %v784_v59, 0.7853982  ;;  %v4724_v59 = vld [vmem:[%s5809_s1] ss:$0 sm:$0xff] }
 0x125   : > { %v3958_v14 = vpop.eup %3957  ;;  %v468_v34 = vxor.u32 2147483648, %v3956_v48  ;;  %vm3716_vm12 = vcmp.lt.s32.totalorder %v3715_v20, 0  ;;  %v719_v9 = vsel %vm713_vm11, %v716_v45, %v718_v53  ;;  %vm737_vm13 = vc.u32 %v4672_v36, %v4676_v38 }
 0x126   : > { %v465_v51 = vxor.u32 2147483648, %v3958_v14  ;;  %v855_v24 = vsel %vm3716_vm12, 0, %v3715_v20  ;;  %v738_v31 = vadd.s32 1, %v4677_v50  ;;  %vm1003_vm14 = vcmp.gt.s32.totalorder %v1002_v4, 0 }
 0x127   : > { %v469_v17 = vsel %vm467_vm10, %v468_v34, %v3958_v14  ;;  %v2147_v26 = vsel %vm2145_vm1, %v468_v34, %v3958_v14  ;;  %v856_v63 = vsub.s32 32, %v855_v24  ;;  %v860_v12 = vsub.s32 4294967266, %v855_v24 }
 0x128   : > { %v466_v40 = vsel %vm464_vm9, %v3956_v48, %v465_v51  ;;  %v2144_v22 = vsel %vm2142_vm0, %v3956_v48, %v465_v51  ;;  %v857_v32 = vshll.u32 %v4635_v10, %v855_v24  ;;  %v735_v46 = vmul.u32 %v728_v30, %v719_v9 }
 0x129   : > { %v470_v8 = vsel %vm463_vm5, %v466_v40, %v469_v17  ;;  %v2148_v11 = vsel %vm2141_vm6, %v2144_v22, %v2147_v26  ;;  %v858_v18 = vshrl.u32 %v840_v35, %v856_v63  ;;  %v861_v49 = vadd.s32 127, %v860_v12 }
 0x12a   : > { %v471_v15 = vsel %vm460_vm8, nan, %v470_v8  ;;  %v2149_v16 = vsel %vm460_vm8, nan, %v2148_v11  ;;  %v992_v41 = vand.u32 2147483647, %v4608_v28  ;;  %v1004_v43 = vsel %vm1003_vm14, %v1002_v4, 0 }
 0x12b   : > { %1929 = vst [vmem:[%s4455_s30 + $0x10] sm:$0xff] %v471_v15  ;;  %3593 = vst [vmem:[%s4455_s30 + $0x18] sm:$0xff] %v2149_v16  ;;  %v859_v19 = vor.u32 %v858_v18, %v857_v32  ;;  %v862_v61 = vshll.u32 %v861_v49, 23  ;;  %v739_v23 = vsel %vm737_vm13, %v738_v31, %v4677_v50  ;;  %v1006_v10 = vand.u32 31, %v1004_v43 }
 0x12c   : > { %v873_v25 = vsel %vm4713_vm15, 0, %v871_v54  ;;  %v740_v7 = vadd.s32 %v739_v23, %v735_v46  ;;  %v4727_v3 = vmul.f32 %v4724_v59, %v195_v2  ;;  %v999_v6 = vand.u32 8388607, %v992_v41 }
 0x12d   : > { %v863_v55 = vor.u32 4788187, %v862_v61  ;;  %v1007_v47 = vsub.s32 32, %v1006_v10  ;;  %v866_v57 = vcvt.s32.f32 %v859_v19  ;;  %v877_v30 = vadd.s32 3, %v873_v25 }
 0x12e   : > { %v741_v44 = vadd.s32 536870912, %v740_v7  ;;  %v1018_v21 = vshll.u32 %v4077_v60, %v1006_v10  ;;  %v891_v14 = vand.u32 2139095040, %v4727_v3  ;;  %v4740_v35 = vshrl.u32 %v1004_v43, 5 }
 0x12f   : > { %v864_v29 = vand.u32 2147483647, %v863_v55  ;;  %v1010_v37 = vshrl.u32 %v4075_v56, %v1007_v47  ;;  %v1013_v33 = vshrl.u32 %v4076_v58, %v1007_v47  ;;  %v1019_v48 = vshrl.u32 %v4078_v62, %v1007_v47 }
 0x130   : > { %v4731_v42 = vshrl.u32 %v741_v44, 30  ;;  %v1016_v1 = vshrl.u32 %v4077_v60, %v1007_v47  ;;  %v1009_v50 = vshll.u32 %v4074_v52, %v1006_v10  ;;  %v1012_v51 = vshll.u32 %v4075_v56, %v1006_v10 }
 0x131   : > { %v867_v20 = vmul.f32 %v866_v57, %v864_v29  ;;  %v1015_v53 = vshll.u32 %v4076_v58, %v1006_v10  ;;  %v1020_v17 = vor.u32 %v1019_v48, %v1018_v21  ;;  %v1022_v26 = vshrl.u32 %v4079_v5, %v1007_v47 }
 0x132   : > { %v743_v34 = vshll.u32 %v4731_v42, 30  ;;  %v4746_v24 = vand.u32 3, %v873_v25  ;;  %v1011_v40 = vor.u32 %v1010_v37, %v1009_v50  ;;  %v1014_v22 = vor.u32 %v1013_v33, %v1012_v51 }
 0x133   : > { %v868_v45 = vxor.u32 2147483648, %v867_v20  ;;  %v1000_v54 = vor.u32 8388608, %v999_v6  ;;  %v1017_v8 = vor.u32 %v1016_v1, %v1015_v53  ;;  %v1021_v11 = vshll.u32 %v4078_v62, %v1006_v10 }
 0x134   : > { %v4748_v4 = vsub.s32 %v740_v7, %v743_v34  ;;  %vm1027_vm1 = vcmp.lt.s32.totalorder %v4740_v35, 4  ;;  %v892_v15 = vshrl.u32 %v891_v14, 23  ;;  %vm682_vm2 = vcmp.lt.s32.totalorder %v4521_v0, 0 }
 0x135   : > { %v869_v63 = vsel %vm786_vm3, %v868_v45, %v867_v20  ;;  %v1023_v16 = vor.u32 %v1022_v26, %v1021_v11  ;;  %vm1024_vm0 = vcmp.lt.s32.totalorder %v4740_v35, 1  ;;  %v1033_v18 = vsel %vm1027_vm1, %v1020_v17, 920167782 }
 0x136   : > { %v872_v12 = vsel %vm4713_vm15, %v4355_v27, %v869_v63  ;;  %v746_v9 = vsub.s32 0, %v4748_v4  ;;  %vm1026_vm3 = vcmp.lt.s32.totalorder %v4740_v35, 3  ;;  %v1032_v49 = vsel %vm1024_vm0, %v1011_v40, %v1014_v22 }
 0x137   : > { %3959 = vcosq.f32 %v872_v12  ;;  %v878_v31 = vand.u32 3, %v877_v30  ;;  %v1008_v39 = vshrl.u32 %v4074_v52, %v1007_v47  ;;  %v1034_v46 = vsel %vm1026_vm3, %v1017_v8, %v1033_v18 }
 0x138   : > { %3961 = vsinq.f32 %v872_v12  ;;  %v3710_v32 = vmin.u32 %v746_v9, %v4748_v4  ;;  %v4769_v43 = vshll.u32 %v1000_v54, 8  ;;  %vm4773_vm4 = vcmp.le.f32.partialorder %v680_v13, 0.7853982 }
 0x139   : > { %v766_v61 = vsub.s32 4, %v4731_v42  ;;  %vm1025_vm5 = vcmp.lt.s32.totalorder %v4740_v35, 2  ;;  %v1036_v23 = vsel %vm1024_vm0, %v1014_v22, %v1017_v8  ;;  %vm2557_vm6 = vcmp.eq.s32.totalorder %v4746_v24, 2 }
 0x13a   : > { %v748_v19 = vclz %v3710_v32  ;;  %v1029_v10 = vsel %vm1027_vm1, %v1017_v8, 2102212464  ;;  %v1035_v25 = vsel %vm1025_vm5, %v1032_v49, %v1034_v46  ;;  %v1037_v13 = vsel %vm1027_vm1, %v1023_v16, 1326507024 }
 0x13b   : > { %v3717_v7 = vadd.s32 4294967169, %v892_v15  ;;  %vm2554_vm7 = vcmp.eq.s32.totalorder %v4746_v24, 0  ;;  %v1038_v47 = vsel %vm1026_vm3, %v1020_v17, %v1037_v13  ;;  %vm879_vm8 = vcmp.lt.s32.totalorder %v878_v31, 2 }
 0x13c   : > { %v3711_v55 = vadd.s32 4294967294, %v748_v19  ;;  %v4792_v44 = vmul.u32.u64.low %v4769_v43, %v1035_v25  ;;  %v4793_v29 = vmul.u32.u64.high %v4769_v43, %v1035_v25, %v4792_v44  ;;  %vm2553_vm9 = vcmp.lt.s32.totalorder %v4746_v24, 2 }
 0x13d   : > { %v1028_v57 = vsel %vm1024_vm0, %v1008_v39, %v1011_v40  ;;  %v1039_v30 = vsel %vm1025_vm5, %v1036_v23, %v1038_v47  ;;  %v898_v6 = vadd.s32 1, %v3717_v7  ;;  %vm876_vm10 = vweird.f32 %v4355_v27 }
 0x13e   : > { %vm3712_vm11 = vcmp.lt.s32.totalorder %v3711_v55, 0  ;;  %v1030_v37 = vsel %vm1026_vm3, %v1014_v22, %v1029_v10  ;;  %v4805_v33 = vmul.u32.u64.low %v4769_v43, %v1039_v30  ;;  %v4806_v48 = vmul.u32.u64.high %v4769_v43, %v1039_v30, %v4805_v33 }
 0x13f   : > { %vm880_vm12 = vcmp.eq.s32.totalorder %v878_v31, 0  ;;  %vm883_vm13 = vcmp.eq.s32.totalorder %v878_v31, 2  ;;  %v751_v20 = vsel %vm3712_vm11, 0, %v3711_v55  ;;  %vm899_vm14 = vcmp.gt.s32.totalorder %v898_v6, 0 }
 0x140   : > { %v736_v1 = vadd.s32 %v4676_v38, %v4672_v36  ;;  %v752_v21 = vsub.s32 32, %v751_v20  ;;  %v756_v14 = vsub.s32 4294967266, %v751_v20  ;;  %v767_v34 = vsel %vm682_vm2, %v766_v61, %v4731_v42 }
 0x141   : > { %v3960_v50 = vpop.eup %3959  ;;  %v1031_v51 = vsel %vm1025_vm5, %v1028_v57, %v1030_v37  ;;  %v1050_v45 = vadd.s32 1, %v4793_v29  ;;  %v888_v53 = vand.u32 2147483647, %v4727_v3  ;;  %v900_v17 = vsel %vm899_vm14, %v898_v6, 0 }
 0x142   : > { %v3962_v26 = vpop.eup %3961  ;;  %v884_v40 = vxor.u32 2147483648, %v3960_v50  ;;  %v753_v22 = vshll.u32 %v4748_v4, %v751_v20  ;;  %v754_v36 = vshrl.u32 %v736_v1, %v752_v21  ;;  %v757_v38 = vadd.s32 127, %v756_v14 }
 0x143   : > { %v881_v63 = vxor.u32 2147483648, %v3962_v26  ;;  %v769_v54 = vsel %vm4773_vm4, 0, %v767_v34  ;;  %vm1049_vm15 = vc.u32 %v4806_v48, %v4792_v44  ;;  %v902_v42 = vand.u32 31, %v900_v17 }
 0x144   : > { %v885_v35 = vsel %vm883_vm13, %v884_v40, %v3962_v26  ;;  %v2559_v8 = vsel %vm2557_vm6, %v884_v40, %v3962_v26  ;;  %v755_v11 = vor.u32 %v754_v36, %v753_v22  ;;  %v758_v12 = vshll.u32 %v757_v38, 23 }
 0x145   : > { %v882_v4 = vsel %vm880_vm12, %v3960_v50, %v881_v63  ;;  %v2556_v9 = vsel %vm2554_vm7, %v3960_v50, %v881_v63  ;;  %v1047_v15 = vmul.u32 %v4769_v43, %v1031_v51  ;;  %v1051_v16 = vsel %vm1049_vm15, %v1050_v45, %v4793_v29  ;;  %v210_v50 = vpop.permute.xlu1 %209 }
 0x146   : > { %v886_v18 = vsel %vm879_vm8, %v882_v4, %v885_v35  ;;  %v2560_v32 = vsel %vm2553_vm9, %v2556_v9, %v2559_v8  ;;  %v759_v49 = vor.u32 4788187, %v758_v12  ;;  %v903_v39 = vsub.s32 32, %v902_v42 }
 0x147   : > { %v887_v46 = vsel %vm876_vm10, nan, %v886_v18  ;;  %v2561_v19 = vsel %vm876_vm10, nan, %v2560_v32  ;;  %v1052_v61 = vadd.s32 %v1051_v16, %v1047_v15  ;;  %v762_v43 = vcvt.s32.f32 %v755_v11 }
 0x148   : > { %1933 = vst [vmem:[%s4455_s30 + $0x50] sm:$0xff] %v887_v46  ;;  %3597 = vst [vmem:[%s4455_s30 + $0x58] sm:$0xff] %v2561_v19  ;;  %v760_v23 = vand.u32 2147483647, %v759_v49  ;;  %v773_v10 = vadd.s32 3, %v769_v54  ;;  %v4839_v25 = vand.u32 3, %v769_v54  ;;  %v912_v55 = vshrl.u32 %v4077_v60, %v903_v39 }
 0x149   : > { %v1053_v31 = vadd.s32 536870912, %v1052_v61  ;;  %v895_v24 = vand.u32 8388607, %v888_v53  ;;  %v901_v7 = vshrl.u32 %v900_v17, 5  ;;  %v915_v47 = vshrl.u32 %v4078_v62, %v903_v39 }
 0x14a   : > { %v763_v13 = vmul.f32 %v762_v43, %v760_v23  ;;  %v906_v29 = vshrl.u32 %v4075_v56, %v903_v39  ;;  %v909_v57 = vshrl.u32 %v4076_v58, %v903_v39  ;;  %v911_v30 = vshll.u32 %v4076_v58, %v902_v42 }
 0x14b   : > { %v1054_v27 = vshrl.u32 %v1053_v31, 30  ;;  %v914_v37 = vshll.u32 %v4077_v60, %v902_v42  ;;  %v917_v33 = vshll.u32 %v4078_v62, %v902_v42  ;;  %v918_v20 = vshrl.u32 %v4079_v5, %v903_v39 }
 0x14c   : > { %v764_v6 = vxor.u32 2147483648, %v763_v13  ;;  %v4851_v1 = vand.u32 3, %v773_v10  ;;  %v905_v14 = vshll.u32 %v4074_v52, %v902_v42  ;;  %v908_v34 = vshll.u32 %v4075_v56, %v902_v42 }
 0x14d   : > { %v1055_v21 = vshll.u32 %v1054_v27, 30  ;;  %vm994_vm1 = vcmp.lt.s32.totalorder %v4608_v28, 0  ;;  %v913_v45 = vor.u32 %v912_v55, %v911_v30  ;;  %v916_v17 = vor.u32 %v915_v47, %v914_v37 }
 0x14e   : > { %v765_v51 = vsel %vm682_vm2, %v764_v6, %v763_v13  ;;  %v919_v26 = vor.u32 %v918_v20, %v917_v33  ;;  %v907_v36 = vor.u32 %v906_v29, %v905_v14  ;;  %v910_v38 = vor.u32 %v909_v57, %v908_v34 }
 0x14f   : > { %v768_v40 = vsel %vm4773_vm4, %v4521_v0, %v765_v51  ;;  %v4861_v22 = vsub.s32 %v1052_v61, %v1055_v21  ;;  %v896_v63 = vor.u32 8388608, %v895_v24  ;;  %vm920_vm0 = vcmp.lt.s32.totalorder %v901_v7, 1 }
 0x150   : > { %3963 = vcosq.f32 %v768_v40  ;;  %v4864_v54 = vmul.f32 %v4724_v59, %v210_v50  ;;  %vm4868_vm2 = vcmp.le.f32.partialorder %v992_v41, 0.7853982  ;;  %v1078_v35 = vsub.s32 4, %v1054_v27 }
 0x151   : > { %3965 = vsinq.f32 %v768_v40  ;;  %v1058_v2 = vsub.s32 0, %v4861_v22  ;;  %vm923_vm3 = vcmp.lt.s32.totalorder %v901_v7, 4  ;;  %v904_v8 = vshrl.u32 %v4074_v52, %v903_v39 }
 0x152   : > { %v925_v11 = vsel %vm923_vm3, %v913_v45, 2102212464  ;;  %v929_v12 = vsel %vm923_vm3, %v916_v17, 920167782  ;;  %v933_v4 = vsel %vm923_vm3, %v919_v26, 1326507024  ;;  %v928_v15 = vsel %vm920_vm0, %v907_v36, %v910_v38 }
 0x153   : > { %v3722_v9 = vmin.u32 %v1058_v2, %v4861_v22  ;;  %vm922_vm4 = vcmp.lt.s32.totalorder %v901_v7, 3  ;;  %v932_v16 = vsel %vm920_vm0, %v910_v38, %v913_v45  ;;  %vm2454_vm5 = vcmp.eq.s32.totalorder %v4839_v25, 2 }
 0x154   : > { %v930_v41 = vsel %vm922_vm4, %v913_v45, %v929_v12  ;;  %v934_v18 = vsel %vm922_vm4, %v916_v17, %v933_v4  ;;  %v936_v32 = vshll.u32 %v896_v63, 8  ;;  %vm2451_vm6 = vcmp.eq.s32.totalorder %v4839_v25, 0  ;;  %v205_v63 = vpop.permute.xlu0 %204 }
 0x155   : > { %v1060_v49 = vclz %v3722_v9  ;;  %vm921_vm7 = vcmp.lt.s32.totalorder %v901_v7, 2  ;;  %v924_v39 = vsel %vm920_vm0, %v904_v8, %v907_v36  ;;  %v926_v46 = vsel %vm922_vm4, %v910_v38, %v925_v11 }
 0x156   : > { %vm775_vm8 = vcmp.lt.s32.totalorder %v4851_v1, 2  ;;  %vm2450_vm9 = vcmp.lt.s32.totalorder %v4839_v25, 2  ;;  %v931_v19 = vsel %vm921_vm7, %v928_v15, %v930_v41  ;;  %v935_v61 = vsel %vm921_vm7, %v932_v16, %v934_v18 }
 0x157   : > { %v1203_v23 = vand.u32 2139095040, %v4864_v54  ;;  %vm772_vm10 = vweird.f32 %v4521_v0  ;;  %v3723_v43 = vadd.s32 4294967294, %v1060_v49  ;;  %v1079_v10 = vsel %vm994_vm1, %v1078_v35, %v1054_v27 }
 0x158   : > { %v4886_v31 = vmul.u32.u64.low %v936_v32, %v935_v61  ;;  %v4887_v24 = vmul.u32.u64.high %v936_v32, %v935_v61, %v4886_v31  ;;  %v927_v13 = vsel %vm921_vm7, %v924_v39, %v926_v46  ;;  %vm776_vm11 = vcmp.eq.s32.totalorder %v4851_v1, 0 }
 0x159   : > { %v4889_v7 = vmul.u32.u64.low %v936_v32, %v931_v19  ;;  %v4890_v55 = vmul.u32.u64.high %v936_v32, %v931_v19, %v4889_v7  ;;  %v1204_v47 = vshrl.u32 %v1203_v23, 23  ;;  %vm779_vm12 = vcmp.eq.s32.totalorder %v4851_v1, 2 }
 0x15a   : > { %vm3724_vm13 = vcmp.lt.s32.totalorder %v3723_v43, 0  ;;  %v1200_v29 = vand.u32 2147483647, %v4864_v54  ;;  %v3964_v57 = vpop.eup %3963  ;;  %v1048_v27 = vadd.s32 %v4792_v44, %v4806_v48  ;;  %v1081_v6 = vsel %vm4868_vm2, 0, %v1079_v10 }
 0x15b   : > { %v1063_v30 = vsel %vm3724_vm13, 0, %v3723_v43  ;;  %v3729_v37 = vadd.s32 4294967169, %v1204_v47  ;;  %v3966_v33 = vpop.eup %3965  ;;  %v780_v20 = vxor.u32 2147483648, %v3964_v57  ;;  %v943_v34 = vmul.u32 %v936_v32, %v927_v13 }
 0x15c   : > { %v1064_v21 = vsub.s32 32, %v1063_v30  ;;  %v1068_v14 = vsub.s32 4294967266, %v1063_v30  ;;  %v777_v50 = vxor.u32 2147483648, %v3966_v33  ;;  %v1065_v51 = vshll.u32 %v4861_v22, %v1063_v30 }
 0x15d   : > { %vm945_vm14 = vc.u32 %v4887_v24, %v4889_v7  ;;  %v946_v45 = vadd.s32 1, %v4890_v55  ;;  %v781_v44 = vsel %vm779_vm12, %v780_v20, %v3966_v33  ;;  %v2456_v48 = vsel %vm2454_vm5, %v780_v20, %v3966_v33 }
 0x15e   : > { %v1066_v17 = vshrl.u32 %v1048_v27, %v1064_v21  ;;  %v1069_v26 = vadd.s32 127, %v1068_v14  ;;  %v778_v40 = vsel %vm776_vm11, %v3964_v57, %v777_v50  ;;  %v2453_v22 = vsel %vm2451_vm6, %v3964_v57, %v777_v50 }
 0x15f   : > { %v947_v36 = vsel %vm945_vm14, %v946_v45, %v4890_v55  ;;  %v1210_v38 = vadd.s32 1, %v3729_v37  ;;  %v782_v2 = vsel %vm775_vm8, %v778_v40, %v781_v44  ;;  %v2457_v35 = vsel %vm2450_vm9, %v2453_v22, %v2456_v48 }
 0x160   : > { %v1067_v8 = vor.u32 %v1066_v17, %v1065_v51  ;;  %v1070_v11 = vshll.u32 %v1069_v26, 23  ;;  %v783_v12 = vsel %vm772_vm10, nan, %v782_v2  ;;  %v2458_v4 = vsel %vm772_vm10, nan, %v2457_v35 }
 0x161   : > { %v948_v9 = vadd.s32 %v947_v36, %v943_v34  ;;  %vm1211_vm15 = vcmp.gt.s32.totalorder %v1210_v38, 0  ;;  %1932 = vst [vmem:[%s4455_s30 + $0x40] sm:$0xff] %v783_v12  ;;  %3596 = vst [vmem:[%s4455_s30 + $0x48] sm:$0xff] %v2458_v4  ;;  %v4924_v1 = vmul.f32 %v4724_v59, %v205_v63  ;;  %v1085_v41 = vadd.s32 3, %v1081_v6 }
 0x162   : > { %v1071_v15 = vor.u32 4788187, %v1070_v11  ;;  %v1212_v16 = vsel %vm1211_vm15, %v1210_v38, 0  ;;  %v1207_v18 = vand.u32 8388607, %v1200_v29  ;;  %v1074_v39 = vcvt.s32.f32 %v1067_v8 }
 0x163   : > { %v949_v25 = vadd.s32 536870912, %v948_v9  ;;  %v1214_v32 = vand.u32 31, %v1212_v16  ;;  %v4930_v61 = vand.u32 3, %v1081_v6  ;;  %v4932_v23 = vand.u32 3, %v1085_v41 }
 0x164   : > { %v1072_v49 = vand.u32 2147483647, %v1071_v15  ;;  %v1208_v10 = vor.u32 8388608, %v1207_v18  ;;  %v1096_v31 = vand.u32 2147483647, %v4924_v1  ;;  %v1099_v57 = vand.u32 2139095040, %v4924_v1 }
 0x165   : > { %v4928_v46 = vshrl.u32 %v949_v25, 30  ;;  %v1215_v0 = vsub.s32 32, %v1214_v32  ;;  %v4941_v30 = vshrl.u32 %v1212_v16, 5  ;;  %vm890_vm0 = vcmp.lt.s32.totalorder %v4727_v3, 0 }
 0x166   : > { %v1075_v19 = vmul.f32 %v1074_v39, %v1072_v49  ;;  %v1217_v20 = vshll.u32 %v4074_v52, %v1214_v32  ;;  %v1220_v21 = vshll.u32 %v4075_v56, %v1214_v32  ;;  %v1223_v51 = vshll.u32 %v4076_v58, %v1214_v32 }
 0x167   : > { %v951_v43 = vshll.u32 %v4928_v46, 30  ;;  %v1218_v55 = vshrl.u32 %v4075_v56, %v1215_v0  ;;  %v1221_v47 = vshrl.u32 %v4076_v58, %v1215_v0  ;;  %v1224_v6 = vshrl.u32 %v4077_v60, %v1215_v0 }
 0x168   : > { %v1076_v13 = vxor.u32 2147483648, %v1075_v19  ;;  %v1227_v37 = vshrl.u32 %v4078_v62, %v1215_v0  ;;  %v1230_v14 = vshrl.u32 %v4079_v5, %v1215_v0  ;;  %v1226_v45 = vshll.u32 %v4077_v60, %v1214_v32 }
 0x169   : > { %v4939_v27 = vsub.s32 %v948_v9, %v951_v43  ;;  %v1219_v44 = vor.u32 %v1218_v55, %v1217_v20  ;;  %v1222_v48 = vor.u32 %v1221_v47, %v1220_v21  ;;  %v1229_v17 = vshll.u32 %v4078_v62, %v1214_v32 }
 0x16a   : > { %v1077_v33 = vsel %vm994_vm1, %v1076_v13, %v1075_v19  ;;  %vm4960_vm1 = vcmp.le.f32.partialorder %v888_v53, 0.7853982  ;;  %v1225_v40 = vor.u32 %v1224_v6, %v1223_v51  ;;  %v1228_v22 = vor.u32 %v1227_v37, %v1226_v45 }
 0x16b   : > { %v1080_v34 = vsel %vm4868_vm2, %v4608_v28, %v1077_v33  ;;  %v954_v50 = vsub.s32 0, %v4939_v27  ;;  %v944_v36 = vadd.s32 %v4889_v7, %v4887_v24  ;;  %v1231_v38 = vor.u32 %v1230_v14, %v1229_v17 }
 0x16c   : > { %3967 = vcosq.f32 %v1080_v34  ;;  %v4967_v63 = vshll.u32 %v1208_v10, 8  ;;  %v1100_v2 = vshrl.u32 %v1099_v57, 23  ;;  %v974_v8 = vsub.s32 4, %v4928_v46 }
 0x16d   : > { %3969 = vsinq.f32 %v1080_v34  ;;  %v3718_v42 = vmin.u32 %v954_v50, %v4939_v27  ;;  %vm1232_vm2 = vcmp.lt.s32.totalorder %v4941_v30, 1  ;;  %v4973_v53 = vand.u32 8388607, %v1096_v31 }
 0x16e   : > { %vm1091_vm3 = vcmp.eq.s32.totalorder %v4932_v23, 2  ;;  %vm2763_vm4 = vcmp.eq.s32.totalorder %v4930_v61, 2  ;;  %v1216_v11 = vshrl.u32 %v4074_v52, %v1215_v0  ;;  %vm1233_vm5 = vcmp.lt.s32.totalorder %v4941_v30, 2 }
 0x16f   : > { %v956_v35 = vclz %v3718_v42  ;;  %vm1235_vm6 = vcmp.lt.s32.totalorder %v4941_v30, 4  ;;  %v1240_v24 = vsel %vm1232_vm2, %v1219_v44, %v1222_v48  ;;  %vm1088_vm7 = vcmp.eq.s32.totalorder %v4932_v23, 0 }
 0x170   : > { %vm2760_vm8 = vcmp.eq.s32.totalorder %v4930_v61, 0  ;;  %vm1234_vm9 = vcmp.lt.s32.totalorder %v4941_v30, 3  ;;  %v1241_v12 = vsel %vm1235_vm6, %v1228_v22, 920167782  ;;  %v1244_v4 = vsel %vm1232_vm2, %v1222_v48, %v1225_v40 }
 0x171   : > { %v3719_v7 = vadd.s32 4294967294, %v956_v35  ;;  %vm1087_vm10 = vcmp.lt.s32.totalorder %v4932_v23, 2  ;;  %vm2759_vm11 = vcmp.lt.s32.totalorder %v4930_v61, 2  ;;  %v1237_v9 = vsel %vm1235_vm6, %v1225_v40, 2102212464  ;;  %v220_v35 = vpop.permute.xlu1 %219 }
 0x172   : > { %v1242_v15 = vsel %vm1234_vm9, %v1225_v40, %v1241_v12  ;;  %v1245_v16 = vsel %vm1235_vm6, %v1231_v38, 1326507024  ;;  %v3725_v41 = vadd.s32 4294967169, %v1100_v2  ;;  %vm1084_vm12 = vweird.f32 %v4608_v28 }
 0x173   : > { %vm3720_vm13 = vcmp.lt.s32.totalorder %v3719_v7, 0  ;;  %v975_v25 = vsel %vm890_vm0, %v974_v8, %v4928_v46  ;;  %v1243_v18 = vsel %vm1233_vm5, %v1240_v24, %v1242_v15  ;;  %v1246_v32 = vsel %vm1234_vm9, %v1228_v22, %v1245_v16 }
 0x174   : > { %v959_v49 = vsel %vm3720_vm13, 0, %v3719_v7  ;;  %v1247_v39 = vsel %vm1233_vm5, %v1244_v4, %v1246_v32  ;;  %v5002_v0 = vmul.u32.u64.low %v4967_v63, %v1243_v18  ;;  %v5003_v19 = vmul.u32.u64.high %v4967_v63, %v1243_v18, %v5002_v0 }
 0x175   : > { %v960_v43 = vsub.s32 32, %v959_v49  ;;  %v964_v10 = vsub.s32 4294967266, %v959_v49  ;;  %v1236_v46 = vsel %vm1232_vm2, %v1216_v11, %v1219_v44  ;;  %v1238_v13 = vsel %vm1234_vm9, %v1222_v48, %v1237_v9 }
 0x176   : > { %v3968_v55 = vpop.eup %3967  ;;  %v977_v47 = vsel %vm4960_vm1, 0, %v975_v25  ;;  %v5013_v57 = vmul.u32.u64.low %v4967_v63, %v1247_v39  ;;  %v5014_v6 = vmul.u32.u64.high %v4967_v63, %v1247_v39, %v5013_v57  ;;  %v1106_v37 = vadd.s32 1, %v3725_v41 }
 0x177   : > { %v3970_v33 = vpop.eup %3969  ;;  %v1092_v20 = vxor.u32 2147483648, %v3968_v55  ;;  %v961_v21 = vshll.u32 %v4939_v27, %v959_v49  ;;  %v962_v14 = vshrl.u32 %v944_v36, %v960_v43  ;;  %v965_v34 = vadd.s32 127, %v964_v10 }
 0x178   : > { %v1089_v50 = vxor.u32 2147483648, %v3970_v33  ;;  %v1239_v51 = vsel %vm1233_vm5, %v1236_v46, %v1238_v13  ;;  %v1258_v45 = vadd.s32 1, %v5003_v19  ;;  %vm1107_vm14 = vcmp.gt.s32.totalorder %v1106_v37, 0 }
 0x179   : > { %v1093_v44 = vsel %vm1091_vm3, %v1092_v20, %v3970_v33  ;;  %v2765_v48 = vsel %vm2763_vm4, %v1092_v20, %v3970_v33  ;;  %v963_v17 = vor.u32 %v962_v14, %v961_v21  ;;  %v966_v42 = vshll.u32 %v965_v34, 23 }
 0x17a   : > { %v1090_v27 = vsel %vm1088_vm7, %v3968_v55, %v1089_v50  ;;  %v2762_v30 = vsel %vm2760_vm8, %v3968_v55, %v1089_v50  ;;  %v981_v40 = vadd.s32 3, %v977_v47  ;;  %vm1257_vm15 = vc.u32 %v5014_v6, %v5002_v0 }
 0x17b   : > { %v1094_v22 = vsel %vm1087_vm10, %v1090_v27, %v1093_v44  ;;  %v2766_v36 = vsel %vm2759_vm11, %v2762_v30, %v2765_v48  ;;  %v967_v38 = vor.u32 4788187, %v966_v42  ;;  %v1255_v2 = vmul.u32 %v4967_v63, %v1239_v51 }
 0x17c   : > { %v1095_v8 = vsel %vm1084_vm12, nan, %v1094_v22  ;;  %v2767_v11 = vsel %vm1084_vm12, nan, %v2766_v36  ;;  %v1259_v24 = vsel %vm1257_vm15, %v1258_v45, %v5003_v19  ;;  %v1108_v7 = vsel %vm1107_vm14, %v1106_v37, 0 }
 0x17d   : > { %1935 = vst [vmem:[%s4455_s30 + $0x70] sm:$0xff] %v1095_v8  ;;  %3599 = vst [vmem:[%s4455_s30 + $0x78] sm:$0xff] %v2767_v11  ;;  %v968_v23 = vand.u32 2147483647, %v967_v38  ;;  %v970_v12 = vcvt.s32.f32 %v963_v17  ;;  %v1260_v61 = vadd.s32 %v1259_v24, %v1255_v2  ;;  %v1110_v4 = vand.u32 31, %v1108_v7 }
 0x17e   : > { %v5044_v9 = vmul.f32 %v4724_v59, %v220_v35  ;;  %v5046_v41 = vand.u32 3, %v981_v40  ;;  %v5048_v28 = vand.u32 3, %v977_v47  ;;  %v1104_v25 = vor.u32 8388608, %v4973_v53 }
 0x17f   : > { %v971_v63 = vmul.f32 %v970_v12, %v968_v23  ;;  %v1261_v15 = vadd.s32 536870912, %v1260_v61  ;;  %v1111_v16 = vsub.s32 32, %v1110_v4  ;;  %v5051_v49 = vshrl.u32 %v1108_v7, 5 }
 0x180   : > { %v1411_v46 = vand.u32 2139095040, %v5044_v9  ;;  %v1113_v53 = vshll.u32 %v4074_v52, %v1110_v4  ;;  %v1116_v47 = vshll.u32 %v4075_v56, %v1110_v4  ;;  %v1119_v37 = vshll.u32 %v4076_v58, %v1110_v4 }
 0x181   : > { %v972_v18 = vxor.u32 2147483648, %v971_v63  ;;  %v1262_v32 = vshrl.u32 %v1261_v15, 30  ;;  %v1114_v39 = vshrl.u32 %v4075_v56, %v1111_v16  ;;  %v1117_v19 = vshrl.u32 %v4076_v58, %v1111_v16 }
 0x182   : > { %v1120_v43 = vshrl.u32 %v4077_v60, %v1111_v16  ;;  %v1123_v10 = vshrl.u32 %v4078_v62, %v1111_v16  ;;  %v1122_v33 = vshll.u32 %v4077_v60, %v1110_v4  ;;  %v1126_v20 = vshrl.u32 %v4079_v5, %v1111_v16 }
 0x183   : > { %v973_v13 = vsel %vm890_vm0, %v972_v18, %v971_v63  ;;  %v1263_v55 = vshll.u32 %v1262_v32, 30  ;;  %v1115_v14 = vor.u32 %v1114_v39, %v1113_v53  ;;  %v1125_v34 = vshll.u32 %v4078_v62, %v1110_v4 }
 0x184   : > { %v976_v57 = vsel %vm4960_vm1, %v4727_v3, %v973_v13  ;;  %v1118_v50 = vor.u32 %v1117_v19, %v1116_v47  ;;  %v1121_v51 = vor.u32 %v1120_v43, %v1119_v37  ;;  %v1124_v45 = vor.u32 %v1123_v10, %v1122_v33 }
 0x185   : > { %3971 = vcosq.f32 %v976_v57  ;;  %v5068_v21 = vsub.s32 %v1260_v61, %v1263_v55  ;;  %vm1202_vm0 = vcmp.lt.s32.totalorder %v4864_v54, 0  ;;  %v1112_v44 = vshrl.u32 %v4074_v52, %v1111_v16 }
 0x186   : > { %3973 = vsinq.f32 %v976_v57  ;;  %v1127_v48 = vor.u32 %v1126_v20, %v1125_v34  ;;  %v5074_v17 = vshll.u32 %v1104_v25, 8  ;;  %v1408_v42 = vand.u32 2147483647, %v5044_v9 }
 0x187   : > { %v1266_v26 = vsub.s32 0, %v5068_v21  ;;  %vm987_vm1 = vcmp.eq.s32.totalorder %v5046_v41, 2  ;;  %vm2660_vm2 = vcmp.eq.s32.totalorder %v5048_v28, 2  ;;  %v1286_v30 = vsub.s32 4, %v1262_v32 }
 0x188   : > { %vm1128_vm3 = vcmp.lt.s32.totalorder %v5051_v49, 1  ;;  %vm1131_vm4 = vcmp.lt.s32.totalorder %v5051_v49, 4  ;;  %vm984_vm5 = vcmp.eq.s32.totalorder %v5046_v41, 0  ;;  %vm2657_vm6 = vcmp.eq.s32.totalorder %v5048_v28, 0 }
 0x189   : > { %v3730_v27 = vmin.u32 %v1266_v26, %v5068_v21  ;;  %v1133_v40 = vsel %vm1131_vm4, %v1121_v51, 2102212464  ;;  %v1136_v22 = vsel %vm1128_vm3, %v1115_v14, %v1118_v50  ;;  %v1137_v36 = vsel %vm1131_vm4, %v1124_v45, 920167782 }
 0x18a   : > { %v1412_v38 = vshrl.u32 %v1411_v46, 23  ;;  %vm983_vm7 = vcmp.lt.s32.totalorder %v5046_v41, 2  ;;  %vm2656_vm8 = vcmp.lt.s32.totalorder %v5048_v28, 2  ;;  %vm1129_vm9 = vcmp.lt.s32.totalorder %v5051_v49, 2 }
 0x18b   : > { %v1268_v2 = vclz %v3730_v27  ;;  %vm1130_vm10 = vcmp.lt.s32.totalorder %v5051_v49, 3  ;;  %v1140_v35 = vsel %vm1128_vm3, %v1118_v50, %v1121_v51  ;;  %vm980_vm11 = vweird.f32 %v4727_v3 }
 0x18c   : > { %v1132_v8 = vsel %vm1128_vm3, %v1112_v44, %v1115_v14  ;;  %v1138_v11 = vsel %vm1130_vm10, %v1121_v51, %v1137_v36  ;;  %v1141_v24 = vsel %vm1131_vm4, %v1127_v48, 1326507024  ;;  %v3737_v7 = vadd.s32 4294967169, %v1412_v38  ;;  %v215_v36 = vpop.permute.xlu0 %214 }
 0x18d   : > { %v3731_v23 = vadd.s32 4294967294, %v1268_v2  ;;  %v1134_v12 = vsel %vm1130_vm10, %v1118_v50, %v1133_v40  ;;  %v1139_v61 = vsel %vm1129_vm9, %v1136_v22, %v1138_v11  ;;  %v1142_v4 = vsel %vm1130_vm10, %v1124_v45, %v1141_v24 }
 0x18e   : > { %v1256_v63 = vadd.s32 %v5002_v0, %v5014_v6  ;;  %v1143_v15 = vsel %vm1129_vm9, %v1140_v35, %v1142_v4  ;;  %v5102_v16 = vmul.u32.u64.low %v5074_v17, %v1139_v61  ;;  %v5103_v25 = vmul.u32.u64.high %v5074_v17, %v1139_v61, %v5102_v16 }
 0x18f   : > { %v3972_v18 = vpop.eup %3971  ;;  %vm3732_vm12 = vcmp.lt.s32.totalorder %v3731_v23, 0  ;;  %v1287_v39 = vsel %vm1202_vm0, %v1286_v30, %v1262_v32  ;;  %v5109_v19 = vmul.u32.u64.low %v5074_v17, %v1143_v15  ;;  %v5110_v43 = vmul.u32.u64.high %v5074_v17, %v1143_v15, %v5109_v19 }
 0x190   : > { %v3974_v10 = vpop.eup %3973  ;;  %v988_v46 = vxor.u32 2147483648, %v3972_v18  ;;  %v1271_v0 = vsel %vm3732_vm12, 0, %v3731_v23  ;;  %v1135_v6 = vsel %vm1129_vm9, %v1132_v8, %v1134_v12  ;;  %v1418_v13 = vadd.s32 1, %v3737_v7 }
 0x191   : > { %v985_v55 = vxor.u32 2147483648, %v3974_v10  ;;  %v1272_v53 = vsub.s32 32, %v1271_v0  ;;  %v1273_v47 = vshll.u32 %v5068_v21, %v1271_v0  ;;  %v1276_v57 = vsub.s32 4294967266, %v1271_v0 }
 0x192   : > { %v989_v37 = vsel %vm987_vm1, %v988_v46, %v3974_v10  ;;  %v2662_v32 = vsel %vm2660_vm2, %v988_v46, %v3974_v10  ;;  %v1154_v33 = vadd.s32 1, %v5103_v25  ;;  %vm1419_vm13 = vcmp.gt.s32.totalorder %v1418_v13, 0 }
 0x193   : > { %v986_v49 = vsel %vm984_vm5, %v3972_v18, %v985_v55  ;;  %v2659_v20 = vsel %vm2657_vm6, %v3972_v18, %v985_v55  ;;  %v1274_v14 = vshrl.u32 %v1256_v63, %v1272_v53  ;;  %v1277_v21 = vadd.s32 127, %v1276_v57 }
 0x194   : > { %v990_v34 = vsel %vm983_vm7, %v986_v49, %v989_v37  ;;  %v2663_v50 = vsel %vm2656_vm8, %v2659_v20, %v2662_v32  ;;  %v1151_v51 = vmul.u32 %v5074_v17, %v1135_v6  ;;  %vm1153_vm14 = vc.u32 %v5110_v43, %v5102_v16 }
 0x195   : > { %v991_v45 = vsel %vm980_vm11, nan, %v990_v34  ;;  %v2664_v26 = vsel %vm980_vm11, nan, %v2663_v50  ;;  %v1275_v44 = vor.u32 %v1274_v14, %v1273_v47  ;;  %v1278_v48 = vshll.u32 %v1277_v21, 23 }
 0x196   : > { %1934 = vst [vmem:[%s4455_s30 + $0x60] sm:$0xff] %v991_v45  ;;  %3598 = vst [vmem:[%s4455_s30 + $0x68] sm:$0xff] %v2664_v26  ;;  %vm5139_vm15 = vcmp.le.f32.partialorder %v1200_v29, 0.7853982  ;;  %v1155_v28 = vsel %vm1153_vm14, %v1154_v33, %v5103_v25  ;;  %v1420_v17 = vsel %vm1419_vm13, %v1418_v13, 0  ;;  %v5152_v12 = vmul.f32 %v4724_v59, %v215_v36 }
 0x197   : > { %v1279_v27 = vor.u32 4788187, %v1278_v48  ;;  %v1289_v30 = vsel %vm5139_vm15, 0, %v1287_v39  ;;  %v1156_v3 = vadd.s32 %v1155_v28, %v1151_v51  ;;  %v1415_v40 = vand.u32 8388607, %v1408_v42 }
 0x198   : > { %v1422_v22 = vand.u32 31, %v1420_v17  ;;  %v1282_v2 = vcvt.s32.f32 %v1275_v44  ;;  %v1293_v35 = vadd.s32 3, %v1289_v30  ;;  %v5149_v8 = vand.u32 3, %v1289_v30 }
 0x199   : > { %v1280_v38 = vand.u32 2147483647, %v1279_v27  ;;  %v1157_v29 = vadd.s32 536870912, %v1156_v3  ;;  %v1416_v23 = vor.u32 8388608, %v1415_v40  ;;  %v1421_v61 = vshrl.u32 %v1420_v17, 5 }
 0x19a   : > { %v1423_v11 = vsub.s32 32, %v1422_v22  ;;  %v1425_v39 = vshll.u32 %v4074_v52, %v1422_v22  ;;  %vm1098_vm1 = vcmp.lt.s32.totalorder %v4924_v1, 0  ;;  %v1428_v10 = vshll.u32 %v4075_v56, %v1422_v22 }
 0x19b   : > { %v1283_v24 = vmul.f32 %v1282_v2, %v1280_v38  ;;  %v1158_v7 = vshrl.u32 %v1157_v29, 30  ;;  %v1431_v59 = vshll.u32 %v4076_v58, %v1422_v22  ;;  %v1434_v46 = vshll.u32 %v4077_v60, %v1422_v22 }
 0x19c   : > { %v1426_v4 = vshrl.u32 %v4075_v56, %v1423_v11  ;;  %v1429_v63 = vshrl.u32 %v4076_v58, %v1423_v11  ;;  %v1432_v15 = vshrl.u32 %v4077_v60, %v1423_v11  ;;  %v1435_v19 = vshrl.u32 %v4078_v62, %v1423_v11 }
 0x19d   : > { %v1284_v25 = vxor.u32 2147483648, %v1283_v24  ;;  %v1159_v18 = vshll.u32 %v1158_v7, 30  ;;  %v1438_v0 = vshrl.u32 %v4079_v5, %v1423_v11  ;;  %v1437_v53 = vshll.u32 %v4078_v62, %v1422_v22 }
 0x19e   : > { %v1427_v55 = vor.u32 %v1426_v4, %v1425_v39  ;;  %v1430_v57 = vor.u32 %v1429_v63, %v1428_v10  ;;  %v1433_v37 = vor.u32 %v1432_v15, %v1431_v59  ;;  %v1436_v32 = vor.u32 %v1435_v19, %v1434_v46 }
 0x19f   : > { %v1285_v6 = vsel %vm1202_vm0, %v1284_v25, %v1283_v24  ;;  %v5166_v13 = vsub.s32 %v1156_v3, %v1159_v18  ;;  %v5172_v33 = vand.u32 3, %v1293_v35  ;;  %v5175_v20 = vshll.u32 %v1416_v23, 8 }
 0x1a0   : > { %v1288_v47 = vsel %vm5139_vm15, %v4864_v54, %v1285_v6  ;;  %v1439_v14 = vor.u32 %v1438_v0, %v1437_v53  ;;  %vm1440_vm0 = vcmp.lt.s32.totalorder %v1421_v61, 1  ;;  %v1307_v21 = vand.u32 2139095040, %v5152_v12 }
 0x1a1   : > { %3975 = vcosq.f32 %v1288_v47  ;;  %v1162_v49 = vsub.s32 0, %v5166_v13  ;;  %vm5180_vm2 = vcmp.le.f32.partialorder %v1096_v31, 0.7853982  ;;  %v1182_v51 = vsub.s32 4, %v1158_v7 }
 0x1a2   : > { %3977 = vsinq.f32 %v1288_v47  ;;  %v1424_v45 = vshrl.u32 %v4074_v52, %v1423_v11  ;;  %vm1443_vm3 = vcmp.lt.s32.totalorder %v1421_v61, 4  ;;  %vm1441_vm4 = vcmp.lt.s32.totalorder %v1421_v61, 2 }
 0x1a3   : > { %v3726_v50 = vmin.u32 %v1162_v49, %v5166_v13  ;;  %v1445_v26 = vsel %vm1443_vm3, %v1433_v37, 2102212464  ;;  %v1448_v44 = vsel %vm1440_vm0, %v1427_v55, %v1430_v57  ;;  %v1449_v48 = vsel %vm1443_vm3, %v1436_v32, 920167782 }
 0x1a4   : > { %vm2969_vm5 = vcmp.eq.s32.totalorder %v5149_v8, 2  ;;  %vm1442_vm6 = vcmp.lt.s32.totalorder %v1421_v61, 3  ;;  %v1444_v28 = vsel %vm1440_vm0, %v1424_v45, %v1427_v55  ;;  %v1452_v17 = vsel %vm1440_vm0, %v1430_v57, %v1433_v37 }
 0x1a5   : > { %v1164_v41 = vclz %v3726_v50  ;;  %vm2966_vm7 = vcmp.eq.s32.totalorder %v5149_v8, 0  ;;  %v1446_v31 = vsel %vm1442_vm6, %v1430_v57, %v1445_v26  ;;  %v1450_v27 = vsel %vm1442_vm6, %v1433_v37, %v1449_v48  ;;  %v230_v26 = vpop.permute.xlu1 %229 }
 0x1a6   : > { %v1453_v30 = vsel %vm1443_vm3, %v1439_v14, 1326507024  ;;  %v1308_v3 = vshrl.u32 %v1307_v21, 23  ;;  %vm1295_vm8 = vcmp.lt.s32.totalorder %v5172_v33, 2  ;;  %vm2965_vm9 = vcmp.lt.s32.totalorder %v5149_v8, 2 }
 0x1a7   : > { %v3727_v40 = vadd.s32 4294967294, %v1164_v41  ;;  %v1183_v22 = vsel %vm1098_vm1, %v1182_v51, %v1158_v7  ;;  %v1451_v36 = vsel %vm1441_vm4, %v1448_v44, %v1450_v27  ;;  %v1454_v38 = vsel %vm1442_vm6, %v1436_v32, %v1453_v30  ;;  %v5241_v27 = vld [vmem:[%s5809_s1] ss:$0 sm:$0xff] }
 0x1a8   : > { %vm1292_vm10 = vweird.f32 %v4864_v54  ;;  %v1447_v2 = vsel %vm1441_vm4, %v1444_v28, %v1446_v31  ;;  %v1455_v29 = vsel %vm1441_vm4, %v1452_v17, %v1454_v38  ;;  %v3733_v7 = vadd.s32 4294967169, %v1308_v3 }
 0x1a9   : > { %v5197_v35 = vmul.u32.u64.low %v5175_v20, %v1451_v36  ;;  %v5198_v11 = vmul.u32.u64.high %v5175_v20, %v1451_v36, %v5197_v35  ;;  %vm3728_vm11 = vcmp.lt.s32.totalorder %v3727_v40, 0  ;;  %vm1296_vm12 = vcmp.eq.s32.totalorder %v5172_v33, 0 }
 0x1aa   : > { %v5202_v24 = vmul.u32.u64.low %v5175_v20, %v1455_v29  ;;  %v5203_v23 = vmul.u32.u64.high %v5175_v20, %v1455_v29, %v5202_v24  ;;  %vm1299_vm13 = vcmp.eq.s32.totalorder %v5172_v33, 2  ;;  %v1152_v4 = vadd.s32 %v5102_v16, %v5110_v43 }
 0x1ab   : > { %v1167_v61 = vsel %vm3728_vm11, 0, %v3727_v40  ;;  %v3976_v63 = vpop.eup %3975  ;;  %v1304_v18 = vand.u32 2147483647, %v5152_v12  ;;  %v1314_v39 = vadd.s32 1, %v3733_v7  ;;  %v1185_v59 = vsel %vm5180_vm2, 0, %v1183_v22 }
 0x1ac   : > { %v1168_v15 = vsub.s32 32, %v1167_v61  ;;  %v1172_v25 = vsub.s32 4294967266, %v1167_v61  ;;  %v3978_v19 = vpop.eup %3977  ;;  %v1300_v10 = vxor.u32 2147483648, %v3976_v63  ;;  %v1463_v46 = vmul.u32 %v5175_v20, %v1447_v2 }
 0x1ad   : > { %v1466_v0 = vadd.s32 1, %v5198_v11  ;;  %v1297_v6 = vxor.u32 2147483648, %v3978_v19  ;;  %v1169_v55 = vshll.u32 %v5166_v13, %v1167_v61  ;;  %vm1465_vm14 = vc.u32 %v5203_v23, %v5197_v35 }
 0x1ae   : > { %v1170_v16 = vshrl.u32 %v1152_v4, %v1168_v15  ;;  %v1173_v43 = vadd.s32 127, %v1172_v25  ;;  %v1301_v53 = vsel %vm1299_vm13, %v1300_v10, %v3978_v19  ;;  %v2971_v47 = vsel %vm2969_vm5, %v1300_v10, %v3978_v19 }
 0x1af   : > { %vm1315_vm15 = vcmp.gt.s32.totalorder %v1314_v39, 0  ;;  %v1298_v57 = vsel %vm1296_vm12, %v3976_v63, %v1297_v6  ;;  %v2968_v13 = vsel %vm2966_vm7, %v3976_v63, %v1297_v6  ;;  %v1467_v14 = vsel %vm1465_vm14, %v1466_v0, %v5198_v11 }
 0x1b0   : > { %v1171_v37 = vor.u32 %v1170_v16, %v1169_v55  ;;  %v1174_v32 = vshll.u32 %v1173_v43, 23  ;;  %v1302_v49 = vsel %vm1295_vm8, %v1298_v57, %v1301_v53  ;;  %v2972_v20 = vsel %vm2965_vm9, %v2968_v13, %v2971_v47 }
 0x1b1   : > { %v1316_v21 = vsel %vm1315_vm15, %v1314_v39, 0  ;;  %v1303_v50 = vsel %vm1292_vm10, nan, %v1302_v49  ;;  %v2973_v51 = vsel %vm1292_vm10, nan, %v2972_v20  ;;  %v1189_v44 = vadd.s32 3, %v1185_v59 }
 0x1b2   : > { %v1175_v45 = vor.u32 4788187, %v1174_v32  ;;  %1937 = vst [vmem:[%s4455_s30 + $0x90] sm:$0xff] %v1303_v50  ;;  %3601 = vst [vmem:[%s4455_s30 + $0x98] sm:$0xff] %v2973_v51  ;;  %v1468_v48 = vadd.s32 %v1467_v14, %v1463_v46  ;;  %v1311_v33 = vand.u32 8388607, %v1304_v18  ;;  %v1178_v28 = vcvt.s32.f32 %v1171_v37 }
 0x1b3   : > { %v1318_v8 = vand.u32 31, %v1316_v21  ;;  %v5244_v54 = vmul.f32 %v5241_v27, %v230_v26  ;;  %v5246_v3 = vand.u32 3, %v1185_v59  ;;  %v5248_v40 = vand.u32 3, %v1189_v44 }
 0x1b4   : > { %v1176_v41 = vand.u32 2147483647, %v1175_v45  ;;  %v1469_v17 = vadd.s32 536870912, %v1468_v48  ;;  %v1312_v36 = vor.u32 8388608, %v1311_v33  ;;  %v5252_v38 = vshrl.u32 %v1316_v21, 5 }
 0x1b5   : > { %v1319_v31 = vsub.s32 32, %v1318_v8  ;;  %v1321_v4 = vshll.u32 %v4074_v52, %v1318_v8  ;;  %v1619_v63 = vand.u32 2139095040, %v5244_v54  ;;  %v1324_v25 = vshll.u32 %v4075_v56, %v1318_v8 }
 0x1b6   : > { %v1179_v30 = vmul.f32 %v1178_v28, %v1176_v41  ;;  %v5250_v22 = vshrl.u32 %v1469_v17, 30  ;;  %v1330_v39 = vshll.u32 %v4077_v60, %v1318_v8  ;;  %v1327_v46 = vshll.u32 %v4076_v58, %v1318_v8 }
 0x1b7   : > { %v1322_v29 = vshrl.u32 %v4075_v56, %v1319_v31  ;;  %v1325_v11 = vshrl.u32 %v4076_v58, %v1319_v31  ;;  %v1331_v24 = vshrl.u32 %v4078_v62, %v1319_v31  ;;  %v1328_v61 = vshrl.u32 %v4077_v60, %v1319_v31 }
 0x1b8   : > { %v1180_v2 = vxor.u32 2147483648, %v1179_v30  ;;  %v1471_v7 = vshll.u32 %v5250_v22, 30  ;;  %v1334_v19 = vshrl.u32 %v4079_v5, %v1319_v31  ;;  %v1333_v0 = vshll.u32 %v4078_v62, %v1318_v8 }
 0x1b9   : > { %v1323_v6 = vor.u32 %v1322_v29, %v1321_v4  ;;  %v1326_v55 = vor.u32 %v1325_v11, %v1324_v25  ;;  %v1332_v16 = vor.u32 %v1331_v24, %v1330_v39  ;;  %v1329_v53 = vor.u32 %v1328_v61, %v1327_v46 }
 0x1ba   : > { %v1181_v15 = vsel %vm1098_vm1, %v1180_v2, %v1179_v30  ;;  %v5269_v59 = vsub.s32 %v1468_v48, %v1471_v7  ;;  %vm1410_vm1 = vcmp.lt.s32.totalorder %v5044_v9, 0  ;;  %v1335_v47 = vor.u32 %v1334_v19, %v1333_v0 }
 0x1bb   : > { %v1184_v10 = vsel %vm5180_vm2, %v4924_v1, %v1181_v15  ;;  %v5275_v57 = vshll.u32 %v1312_v36, 8  ;;  %v1320_v13 = vshrl.u32 %v4074_v52, %v1319_v31  ;;  %vm1336_vm0 = vcmp.lt.s32.totalorder %v5252_v38, 1 }
 0x1bc   : > { %3979 = vcosq.f32 %v1184_v10  ;;  %v1474_v43 = vsub.s32 0, %v5269_v59  ;;  %vm1339_vm2 = vcmp.lt.s32.totalorder %v5252_v38, 4  ;;  %vm1195_vm3 = vcmp.eq.s32.totalorder %v5248_v40, 2 }
 0x1bd   : > { %3981 = vsinq.f32 %v1184_v10  ;;  %vm2866_vm4 = vcmp.eq.s32.totalorder %v5246_v3, 2  ;;  %v1494_v37 = vsub.s32 4, %v5250_v22  ;;  %v1344_v32 = vsel %vm1336_vm0, %v1323_v6, %v1326_v55 }
 0x1be   : > { %v3738_v34 = vmin.u32 %v1474_v43, %v5269_v59  ;;  %v1345_v49 = vsel %vm1339_vm2, %v1332_v16, 920167782  ;;  %v1620_v20 = vshrl.u32 %v1619_v63, 23  ;;  %vm1192_vm5 = vcmp.eq.s32.totalorder %v5248_v40, 0 }
 0x1bf   : > { %vm2863_vm6 = vcmp.eq.s32.totalorder %v5246_v3, 0  ;;  %vm1338_vm7 = vcmp.lt.s32.totalorder %v5252_v38, 3  ;;  %v1341_v21 = vsel %vm1339_vm2, %v1329_v53, 2102212464  ;;  %v1348_v50 = vsel %vm1336_vm0, %v1326_v55, %v1329_v53 }
 0x1c0   : > { %v1476_v14 = vclz %v3738_v34  ;;  %vm1191_vm8 = vcmp.lt.s32.totalorder %v5248_v40, 2  ;;  %vm2862_vm9 = vcmp.lt.s32.totalorder %v5246_v3, 2  ;;  %vm1337_vm10 = vcmp.lt.s32.totalorder %v5252_v38, 2 }
 0x1c1   : > { %v1346_v51 = vsel %vm1338_vm7, %v1329_v53, %v1345_v49  ;;  %v1349_v45 = vsel %vm1339_vm2, %v1335_v47, 1326507024  ;;  %v3745_v26 = vadd.s32 4294967169, %v1620_v20  ;;  %vm1188_vm11 = vweird.f32 %v4924_v1 }
 0x1c2   : > { %v3739_v44 = vadd.s32 4294967294, %v1476_v14  ;;  %v1340_v48 = vsel %vm1336_vm0, %v1320_v13, %v1323_v6  ;;  %v1347_v33 = vsel %vm1337_vm10, %v1344_v32, %v1346_v51  ;;  %v1350_v8 = vsel %vm1338_vm7, %v1332_v16, %v1349_v45 }
 0x1c3   : > { %v1342_v41 = vsel %vm1338_vm7, %v1326_v55, %v1341_v21  ;;  %v1351_v28 = vsel %vm1337_vm10, %v1348_v50, %v1350_v8  ;;  %v5308_v17 = vmul.u32.u64.low %v5275_v57, %v1347_v33  ;;  %v5309_v31 = vmul.u32.u64.high %v5275_v57, %v1347_v33, %v5308_v17 }
 0x1c4   : > { %vm3740_vm12 = vcmp.lt.s32.totalorder %v3739_v44, 0  ;;  %v5313_v30 = vmul.u32.u64.low %v5275_v57, %v1351_v28  ;;  %v5314_v36 = vmul.u32.u64.high %v5275_v57, %v1351_v28, %v5313_v30  ;;  %v1616_v2 = vand.u32 2147483647, %v5244_v54 }
 0x1c5   : > { %v1464_v11 = vadd.s32 %v5197_v35, %v5203_v23  ;;  %v1479_v24 = vsel %vm3740_vm12, 0, %v3739_v44  ;;  %v1495_v7 = vsel %vm1410_vm1, %v1494_v37, %v5250_v22  ;;  %v1626_v4 = vadd.s32 1, %v3745_v26 }
 0x1c6   : > { %v3980_v29 = vpop.eup %3979  ;;  %v1480_v15 = vsub.s32 32, %v1479_v24  ;;  %v1484_v25 = vsub.s32 4294967266, %v1479_v24  ;;  %v1343_v39 = vsel %vm1337_vm10, %v1340_v48, %v1342_v41  ;;  %v1481_v10 = vshll.u32 %v5269_v59, %v1479_v24 }
 0x1c7   : > { %v3982_v61 = vpop.eup %3981  ;;  %v1196_v63 = vxor.u32 2147483648, %v3980_v29  ;;  %v1362_v46 = vadd.s32 1, %v5309_v31  ;;  %vm1627_vm13 = vcmp.gt.s32.totalorder %v1626_v4, 0  ;;  %v1359_v59 = vmul.u32 %v5275_v57, %v1343_v39 }
 0x1c8   : > { %v1193_v19 = vxor.u32 2147483648, %v3982_v61  ;;  %v1482_v22 = vshrl.u32 %v1464_v11, %v1480_v15  ;;  %v1485_v0 = vadd.s32 127, %v1484_v25  ;;  %vm1361_vm14 = vc.u32 %v5314_v36, %v5308_v17  ;;  %v225_v25 = vpop.permute.xlu0 %224 }
 0x1c9   : > { %v1197_v35 = vsel %vm1195_vm3, %v1196_v63, %v3982_v61  ;;  %v2868_v23 = vsel %vm2866_vm4, %v1196_v63, %v3982_v61  ;;  %v1363_v13 = vsel %vm1361_vm14, %v1362_v46, %v5309_v31  ;;  %v1628_v57 = vsel %vm1627_vm13, %v1626_v4, 0 }
 0x1ca   : > { %v1194_v38 = vsel %vm1192_vm5, %v3980_v29, %v1193_v19  ;;  %v2865_v6 = vsel %vm2863_vm6, %v3980_v29, %v1193_v19  ;;  %v1483_v43 = vor.u32 %v1482_v22, %v1481_v10  ;;  %v1486_v53 = vshll.u32 %v1485_v0, 23 }
 0x1cb   : > { %v1198_v55 = vsel %vm1191_vm8, %v1194_v38, %v1197_v35  ;;  %v2869_v16 = vsel %vm2862_vm9, %v2865_v6, %v2868_v23  ;;  %vm5351_vm15 = vcmp.le.f32.partialorder %v1408_v42, 0.7853982  ;;  %v1364_v37 = vadd.s32 %v1363_v13, %v1359_v59 }
 0x1cc   : > { %v1199_v47 = vsel %vm1188_vm11, nan, %v1198_v55  ;;  %v2870_v34 = vsel %vm1188_vm11, nan, %v2869_v16  ;;  %v1487_v3 = vor.u32 4788187, %v1486_v53  ;;  %v1623_v32 = vand.u32 8388607, %v1616_v2 }
 0x1cd   : > { %1936 = vst [vmem:[%s4455_s30 + $0x80] sm:$0xff] %v1199_v47  ;;  %3600 = vst [vmem:[%s4455_s30 + $0x88] sm:$0xff] %v2870_v34  ;;  %v1497_v1 = vsel %vm5351_vm15, 0, %v1495_v7  ;;  %v1630_v49 = vand.u32 31, %v1628_v57  ;;  %v1490_v14 = vcvt.s32.f32 %v1483_v43  ;;  %v1365_v21 = vadd.s32 536870912, %v1364_v37 }
 0x1ce   : > { %v1488_v20 = vand.u32 2147483647, %v1487_v3  ;;  %v1501_v45 = vadd.s32 3, %v1497_v1  ;;  %v1624_v42 = vor.u32 8388608, %v1623_v32  ;;  %v1629_v44 = vshrl.u32 %v1628_v57, 5 }
 0x1cf   : > { %v1631_v50 = vsub.s32 32, %v1630_v49  ;;  %v1366_v26 = vshrl.u32 %v1365_v21, 30  ;;  %v1633_v31 = vshll.u32 %v4074_v52, %v1630_v49  ;;  %vm1306_vm0 = vcmp.lt.s32.totalorder %v5152_v12, 0 }
 0x1d0   : > { %v1491_v51 = vmul.f32 %v1490_v14, %v1488_v20  ;;  %v1636_v29 = vshll.u32 %v4075_v56, %v1630_v49  ;;  %v1639_v11 = vshll.u32 %v4076_v58, %v1630_v49  ;;  %v1642_v24 = vshll.u32 %v4077_v60, %v1630_v49 }
 0x1d1   : > { %v1634_v48 = vshrl.u32 %v4075_v56, %v1631_v50  ;;  %v1637_v33 = vshrl.u32 %v4076_v58, %v1631_v50  ;;  %v1640_v8 = vshrl.u32 %v4077_v60, %v1631_v50  ;;  %v1367_v28 = vshll.u32 %v1366_v26, 30 }
 0x1d2   : > { %v1492_v41 = vxor.u32 2147483648, %v1491_v51  ;;  %v1643_v30 = vshrl.u32 %v4078_v62, %v1631_v50  ;;  %v1646_v7 = vshrl.u32 %v4079_v5, %v1631_v50  ;;  %v1645_v15 = vshll.u32 %v4078_v62, %v1630_v49 }
 0x1d3   : > { %v5371_v61 = vsub.s32 %v1364_v37, %v1367_v28  ;;  %v1635_v63 = vor.u32 %v1634_v48, %v1633_v31  ;;  %v1638_v19 = vor.u32 %v1637_v33, %v1636_v29  ;;  %v1641_v10 = vor.u32 %v1640_v8, %v1639_v11 }
 0x1d4   : > { %v1493_v4 = vsel %vm1410_vm1, %v1492_v41, %v1491_v51  ;;  %v1644_v46 = vor.u32 %v1643_v30, %v1642_v24  ;;  %v5377_v35 = vand.u32 3, %v1501_v45  ;;  %v5379_v23 = vand.u32 3, %v1497_v1 }
 0x1d5   : > { %v1496_v39 = vsel %vm5351_vm15, %v5044_v9, %v1493_v4  ;;  %v1370_v22 = vsub.s32 0, %v5371_v61  ;;  %v1647_v0 = vor.u32 %v1646_v7, %v1645_v15  ;;  %vm1648_vm1 = vcmp.lt.s32.totalorder %v1629_v44, 1 }
 0x1d6   : > { %3983 = vcosq.f32 %v1496_v39  ;;  %v5383_v38 = vmul.f32 %v5241_v27, %v225_v25  ;;  %vm5387_vm2 = vcmp.le.f32.partialorder %v1304_v18, 0.7853982  ;;  %v1390_v55 = vsub.s32 4, %v1366_v26 }
 0x1d7   : > { %3985 = vsinq.f32 %v1496_v39  ;;  %v3734_v59 = vmin.u32 %v1370_v22, %v5371_v61  ;;  %v1632_v16 = vshrl.u32 %v4074_v52, %v1631_v50  ;;  %vm1651_vm3 = vcmp.lt.s32.totalorder %v1629_v44, 4 }
 0x1d8   : > { %v1653_v43 = vsel %vm1651_vm3, %v1641_v10, 2102212464  ;;  %v1656_v53 = vsel %vm1648_vm1, %v1635_v63, %v1638_v19  ;;  %v1657_v47 = vsel %vm1651_vm3, %v1644_v46, 920167782  ;;  %v5393_v34 = vshll.u32 %v1624_v42, 8 }
 0x1d9   : > { %vm3175_vm4 = vcmp.eq.s32.totalorder %v5379_v23, 2  ;;  %v1372_v13 = vclz %v3734_v59  ;;  %vm1650_vm5 = vcmp.lt.s32.totalorder %v1629_v44, 3  ;;  %v1652_v57 = vsel %vm1648_vm1, %v1632_v16, %v1635_v63 }
 0x1da   : > { %v1660_v18 = vsel %vm1648_vm1, %v1638_v19, %v1641_v10  ;;  %vm3172_vm6 = vcmp.eq.s32.totalorder %v5379_v23, 0  ;;  %vm1649_vm7 = vcmp.lt.s32.totalorder %v1629_v44, 2  ;;  %v1654_v40 = vsel %vm1650_vm5, %v1638_v19, %v1653_v43 }
 0x1db   : > { %v1658_v3 = vsel %vm1650_vm5, %v1641_v10, %v1657_v47  ;;  %v1661_v37 = vsel %vm1651_vm3, %v1647_v0, 1326507024  ;;  %vm1503_vm8 = vcmp.lt.s32.totalorder %v5377_v35, 2  ;;  %vm3171_vm9 = vcmp.lt.s32.totalorder %v5379_v23, 2  ;;  %v240_v47 = vpop.permute.xlu1 %239 }
 0x1dc   : > { %v3735_v32 = vadd.s32 4294967294, %v1372_v13  ;;  %v1391_v1 = vsel %vm1306_vm0, %v1390_v55, %v1366_v26  ;;  %v1659_v49 = vsel %vm1649_vm7, %v1656_v53, %v1658_v3  ;;  %v1662_v20 = vsel %vm1650_vm5, %v1644_v46, %v1661_v37 }
 0x1dd   : > { %vm1500_vm10 = vweird.f32 %v5044_v9  ;;  %v1655_v14 = vsel %vm1649_vm7, %v1652_v57, %v1654_v40  ;;  %v1663_v21 = vsel %vm1649_vm7, %v1660_v18, %v1662_v20  ;;  %v1515_v44 = vand.u32 2139095040, %v5383_v38 }
 0x1de   : > { %v5403_v50 = vmul.u32.u64.low %v5393_v34, %v1659_v49  ;;  %v5404_v51 = vmul.u32.u64.high %v5393_v34, %v1659_v49, %v5403_v50  ;;  %vm3736_vm11 = vcmp.lt.s32.totalorder %v3735_v32, 0  ;;  %vm1504_vm12 = vcmp.eq.s32.totalorder %v5377_v35, 0 }
 0x1df   : > { %v5408_v45 = vmul.u32.u64.low %v5393_v34, %v1663_v21  ;;  %v5409_v42 = vmul.u32.u64.high %v5393_v34, %v1663_v21, %v5408_v45  ;;  %vm1507_vm13 = vcmp.eq.s32.totalorder %v5377_v35, 2  ;;  %v1360_v26 = vadd.s32 %v5308_v17, %v5314_v36 }
 0x1e0   : > { %v1375_v48 = vsel %vm3736_vm11, 0, %v3735_v32  ;;  %v3984_v33 = vpop.eup %3983  ;;  %v1512_v28 = vand.u32 2147483647, %v5383_v38  ;;  %v1516_v31 = vshrl.u32 %v1515_v44, 23  ;;  %v1393_v11 = vsel %vm5387_vm2, 0, %v1391_v1 }
 0x1e1   : > { %v1376_v8 = vsub.s32 32, %v1375_v48  ;;  %v1380_v41 = vsub.s32 4294967266, %v1375_v48  ;;  %v3986_v30 = vpop.eup %3985  ;;  %v1508_v29 = vxor.u32 2147483648, %v3984_v33  ;;  %v1671_v24 = vmul.u32 %v5393_v34, %v1655_v14 }
 0x1e2   : > { %v1674_v7 = vadd.s32 1, %v5404_v51  ;;  %v1505_v4 = vxor.u32 2147483648, %v3986_v30  ;;  %v1377_v63 = vshll.u32 %v5371_v61, %v1375_v48  ;;  %vm1673_vm14 = vc.u32 %v5409_v42, %v5403_v50 }
 0x1e3   : > { %v1378_v17 = vshrl.u32 %v1360_v26, %v1376_v8  ;;  %v1381_v36 = vadd.s32 127, %v1380_v41  ;;  %v1509_v15 = vsel %vm1507_vm13, %v1508_v29, %v3986_v30  ;;  %v3177_v25 = vsel %vm3175_vm4, %v1508_v29, %v3986_v30 }
 0x1e4   : > { %v3741_v39 = vadd.s32 4294967169, %v1516_v31  ;;  %v1506_v19 = vsel %vm1504_vm12, %v3984_v33, %v1505_v4  ;;  %v3174_v61 = vsel %vm3172_vm6, %v3984_v33, %v1505_v4  ;;  %v1675_v59 = vsel %vm1673_vm14, %v1674_v7, %v5404_v51 }
 0x1e5   : > { %v1379_v10 = vor.u32 %v1378_v17, %v1377_v63  ;;  %v1382_v46 = vshll.u32 %v1381_v36, 23  ;;  %v1510_v22 = vsel %vm1503_vm8, %v1506_v19, %v1509_v15  ;;  %v3178_v0 = vsel %vm3171_vm9, %v3174_v61, %v3177_v25 }
 0x1e6   : > { %v1522_v55 = vadd.s32 1, %v3741_v39  ;;  %v1511_v16 = vsel %vm1500_vm10, nan, %v1510_v22  ;;  %v3179_v43 = vsel %vm1500_vm10, nan, %v3178_v0  ;;  %v1397_v34 = vadd.s32 3, %v1393_v11 }
 0x1e7   : > { %v1383_v53 = vor.u32 4788187, %v1382_v46  ;;  %1939 = vst [vmem:[%s4455_s30 + $0xb0] sm:$0xff] %v1511_v16  ;;  %3603 = vst [vmem:[%s4455_s30 + $0xb8] sm:$0xff] %v3179_v43  ;;  %v1676_v13 = vadd.s32 %v1675_v59, %v1671_v24  ;;  %v1386_v57 = vcvt.s32.f32 %v1379_v10  ;;  %v1519_v23 = vand.u32 8388607, %v1512_v28 }
 0x1e8   : > { %vm1523_vm15 = vcmp.gt.s32.totalorder %v1522_v55, 0  ;;  %v5446_v37 = vmul.f32 %v5241_v27, %v240_v47  ;;  %vm1618_vm1 = vcmp.lt.s32.totalorder %v5244_v54, 0  ;;  %v5449_v20 = vand.u32 3, %v1397_v34 }
 0x1e9   : > { %v1384_v35 = vand.u32 2147483647, %v1383_v53  ;;  %v1524_v18 = vsel %vm1523_vm15, %v1522_v55, 0  ;;  %v1677_v40 = vadd.s32 536870912, %v1676_v13  ;;  %v5451_v14 = vand.u32 3, %v1393_v11 }
 0x1ea   : > { %v1526_v3 = vand.u32 31, %v1524_v18  ;;  %v1520_v21 = vor.u32 8388608, %v1519_v23  ;;  %v5453_v45 = vshrl.u32 %v1524_v18, 5  ;;  %v1827_v26 = vand.u32 2139095040, %v5446_v37 }
 0x1eb   : > { %v1387_v9 = vmul.f32 %v1386_v57, %v1384_v35  ;;  %v1678_v32 = vshrl.u32 %v1677_v40, 30  ;;  %v1824_v46 = vand.u32 2147483647, %v5446_v37  ;;  %vm3072_vm3 = vcmp.eq.s32.totalorder %v5451_v14, 2 }
 0x1ec   : > { %v1527_v1 = vsub.s32 32, %v1526_v3  ;;  %v1529_v29 = vshll.u32 %v4074_v52, %v1526_v3  ;;  %v1532_v11 = vshll.u32 %v4075_v56, %v1526_v3  ;;  %v1535_v7 = vshll.u32 %v4076_v58, %v1526_v3 }
 0x1ed   : > { %v1388_v49 = vxor.u32 2147483648, %v1387_v9  ;;  %v1679_v51 = vshll.u32 %v1678_v32, 30  ;;  %v1702_v24 = vsub.s32 4, %v1678_v32  ;;  %v1538_v4 = vshll.u32 %v4077_v60, %v1526_v3 }
 0x1ee   : > { %v1530_v44 = vshrl.u32 %v4075_v56, %v1527_v1  ;;  %v1533_v33 = vshrl.u32 %v4076_v58, %v1527_v1  ;;  %v1536_v8 = vshrl.u32 %v4077_v60, %v1527_v1  ;;  %v1539_v41 = vshrl.u32 %v4078_v62, %v1527_v1 }
 0x1ef   : > { %v1389_v48 = vsel %vm1306_vm0, %v1388_v49, %v1387_v9  ;;  %v5465_v30 = vsub.s32 %v1676_v13, %v1679_v51  ;;  %vm5473_vm0 = vcmp.le.f32.partialorder %v1616_v2, 0.7853982  ;;  %v1541_v36 = vshll.u32 %v4078_v62, %v1526_v3 }
 0x1f0   : > { %v1392_v31 = vsel %vm5387_vm2, %v5152_v12, %v1389_v48  ;;  %v1531_v17 = vor.u32 %v1530_v44, %v1529_v29  ;;  %v1534_v15 = vor.u32 %v1533_v33, %v1532_v11  ;;  %v1537_v25 = vor.u32 %v1536_v8, %v1535_v7 }
 0x1f1   : > { %3987 = vcosq.f32 %v1392_v31  ;;  %v1682_v6 = vsub.s32 0, %v5465_v30  ;;  %v1540_v39 = vor.u32 %v1539_v41, %v1538_v4  ;;  %v1542_v19 = vshrl.u32 %v4079_v5, %v1527_v1 }
 0x1f2   : > { %3989 = vsinq.f32 %v1392_v31  ;;  %v5481_v10 = vshll.u32 %v1520_v21, 8  ;;  %v1828_v2 = vshrl.u32 %v1827_v26, 23  ;;  %vm1403_vm2 = vcmp.eq.s32.totalorder %v5449_v20, 2 }
 0x1f3   : > { %v3746_v61 = vmin.u32 %v1682_v6, %v5465_v30  ;;  %v1703_v22 = vsel %vm1618_vm1, %v1702_v24, %v1678_v32  ;;  %v1528_v0 = vshrl.u32 %v4074_v52, %v1527_v1  ;;  %v1543_v59 = vor.u32 %v1542_v19, %v1541_v36 }
 0x1f4   : > { %vm1544_vm4 = vcmp.lt.s32.totalorder %v5453_v45, 1  ;;  %vm1400_vm5 = vcmp.eq.s32.totalorder %v5449_v20, 0  ;;  %vm3069_vm6 = vcmp.eq.s32.totalorder %v5451_v14, 0  ;;  %vm1545_vm7 = vcmp.lt.s32.totalorder %v5453_v45, 2 }
 0x1f5   : > { %v1684_v55 = vclz %v3746_v61  ;;  %vm1546_vm8 = vcmp.lt.s32.totalorder %v5453_v45, 3  ;;  %vm1547_vm9 = vcmp.lt.s32.totalorder %v5453_v45, 4  ;;  %vm1399_vm10 = vcmp.lt.s32.totalorder %v5449_v20, 2 }
 0x1f6   : > { %vm3068_vm11 = vcmp.lt.s32.totalorder %v5451_v14, 2  ;;  %v1548_v16 = vsel %vm1544_vm4, %v1528_v0, %v1531_v17  ;;  %v1549_v43 = vsel %vm1547_vm9, %v1537_v25, 2102212464  ;;  %v1552_v53 = vsel %vm1544_vm4, %v1531_v17, %v1534_v15 }
 0x1f7   : > { %v1553_v47 = vsel %vm1547_vm9, %v1540_v39, 920167782  ;;  %vm1396_vm12 = vweird.f32 %v5152_v12  ;;  %v3747_v34 = vadd.s32 4294967294, %v1684_v55  ;;  %v1550_v13 = vsel %vm1546_vm8, %v1534_v15, %v1549_v43  ;;  %v235_v43 = vpop.permute.xlu0 %234 }
 0x1f8   : > { %v1554_v35 = vsel %vm1546_vm8, %v1537_v25, %v1553_v47  ;;  %v1556_v57 = vsel %vm1544_vm4, %v1534_v15, %v1537_v25  ;;  %v1672_v23 = vadd.s32 %v5403_v50, %v5409_v42  ;;  %v1557_v40 = vsel %vm1547_vm9, %v1543_v59, 1326507024 }
 0x1f9   : > { %v1555_v18 = vsel %vm1545_vm7, %v1552_v53, %v1554_v35  ;;  %v3753_v3 = vadd.s32 4294967169, %v1828_v2  ;;  %vm3748_vm13 = vcmp.lt.s32.totalorder %v3747_v34, 0  ;;  %v1558_v9 = vsel %vm1546_vm8, %v1540_v39, %v1557_v40 }
 0x1fa   : > { %v5515_v32 = vmul.u32.u64.low %v5481_v10, %v1555_v18  ;;  %v5516_v1 = vmul.u32.u64.high %v5481_v10, %v1555_v18, %v5515_v32  ;;  %v1687_v21 = vsel %vm3748_vm13, 0, %v3747_v34  ;;  %v1705_v51 = vsel %vm5473_vm0, 0, %v1703_v22 }
 0x1fb   : > { %v3988_v49 = vpop.eup %3987  ;;  %v1551_v50 = vsel %vm1545_vm7, %v1548_v16, %v1550_v13  ;;  %v1559_v42 = vsel %vm1545_vm7, %v1556_v57, %v1558_v9  ;;  %v1688_v48 = vsub.s32 32, %v1687_v21  ;;  %v1689_v33 = vshll.u32 %v5465_v30, %v1687_v21 }
 0x1fc   : > { %v3990_v44 = vpop.eup %3989  ;;  %v1404_v26 = vxor.u32 2147483648, %v3988_v49  ;;  %v1692_v8 = vsub.s32 4294967266, %v1687_v21  ;;  %v5527_v31 = vmul.u32.u64.low %v5481_v10, %v1559_v42  ;;  %v5528_v29 = vmul.u32.u64.high %v5481_v10, %v1559_v42, %v5527_v31 }
 0x1fd   : > { %v1401_v41 = vxor.u32 2147483648, %v3990_v44  ;;  %v1834_v11 = vadd.s32 1, %v3753_v3  ;;  %v1690_v7 = vshrl.u32 %v1672_v23, %v1688_v48  ;;  %v1570_v17 = vadd.s32 1, %v5516_v1 }
 0x1fe   : > { %v1405_v24 = vsel %vm1403_vm2, %v1404_v26, %v3990_v44  ;;  %v3074_v45 = vsel %vm3072_vm3, %v1404_v26, %v3990_v44  ;;  %v1693_v4 = vadd.s32 127, %v1692_v8  ;;  %v1567_v2 = vmul.u32 %v5481_v10, %v1551_v50 }
 0x1ff   : > { %v1402_v30 = vsel %vm1400_vm5, %v3988_v49, %v1401_v41  ;;  %v3071_v6 = vsel %vm3069_vm6, %v3988_v49, %v1401_v41  ;;  %vm1835_vm14 = vcmp.gt.s32.totalorder %v1834_v11, 0  ;;  %v1691_v25 = vor.u32 %v1690_v7, %v1689_v33 }
 0x200   : > { %v1406_v36 = vsel %vm1399_vm10, %v1402_v30, %v1405_v24  ;;  %v3075_v15 = vsel %vm3068_vm11, %v3071_v6, %v3074_v45  ;;  %v1694_v39 = vshll.u32 %v1693_v4, 23  ;;  %vm1569_vm15 = vc.u32 %v5528_v29, %v5515_v32 }
 0x201   : > { %v1407_v19 = vsel %vm1396_vm12, nan, %v1406_v36  ;;  %v3076_v61 = vsel %vm1396_vm12, nan, %v3075_v15  ;;  %v1571_v22 = vsel %vm1569_vm15, %v1570_v17, %v5516_v1  ;;  %v1836_v14 = vsel %vm1835_vm14, %v1834_v11, 0 }
 0x202   : > { %1938 = vst [vmem:[%s4455_s30 + $0xa0] sm:$0xff] %v1407_v19  ;;  %3602 = vst [vmem:[%s4455_s30 + $0xa8] sm:$0xff] %v3076_v61  ;;  %v1695_v20 = vor.u32 4788187, %v1694_v39  ;;  %v1709_v0 = vadd.s32 3, %v1705_v51  ;;  %v1572_v59 = vadd.s32 %v1571_v22, %v1567_v2  ;;  %v1838_v16 = vand.u32 31, %v1836_v14 }
 0x203   : > { %v1831_v55 = vand.u32 8388607, %v1824_v46  ;;  %v1698_v53 = vcvt.s32.f32 %v1691_v25  ;;  %v5556_v13 = vmul.f32 %v5241_v27, %v235_v43  ;;  %v5560_v57 = vand.u32 3, %v1705_v51 }
 0x204   : > { %v1696_v12 = vand.u32 2147483647, %v1695_v20  ;;  %v1573_v47 = vadd.s32 536870912, %v1572_v59  ;;  %v1839_v10 = vsub.s32 32, %v1838_v16  ;;  %v5558_v35 = vand.u32 3, %v1709_v0 }
 0x205   : > { %v1832_v18 = vor.u32 8388608, %v1831_v55  ;;  %v5568_v21 = vshrl.u32 %v1836_v14, 5  ;;  %v1841_v27 = vshll.u32 %v4074_v52, %v1838_v16  ;;  %v1844_v42 = vshll.u32 %v4075_v56, %v1838_v16 }
 0x206   : > { %v1699_v34 = vmul.f32 %v1698_v53, %v1696_v12  ;;  %v5562_v23 = vshrl.u32 %v1573_v47, 30  ;;  %v1842_v3 = vshrl.u32 %v4075_v56, %v1839_v10  ;;  %v1845_v9 = vshrl.u32 %v4076_v58, %v1839_v10 }
 0x207   : > { %v1851_v1 = vshrl.u32 %v4078_v62, %v1839_v10  ;;  %v1848_v50 = vshrl.u32 %v4077_v60, %v1839_v10  ;;  %v1850_v44 = vshll.u32 %v4077_v60, %v1838_v16  ;;  %v1854_v26 = vshrl.u32 %v4079_v5, %v1839_v10 }
 0x208   : > { %v1700_v40 = vxor.u32 2147483648, %v1699_v34  ;;  %v1575_v49 = vshll.u32 %v5562_v23, 30  ;;  %v1847_v8 = vshll.u32 %v4076_v58, %v1838_v16  ;;  %v1853_v41 = vshll.u32 %v4078_v62, %v1838_v16 }
 0x209   : > { %v1843_v31 = vor.u32 %v1842_v3, %v1841_v27  ;;  %v1846_v11 = vor.u32 %v1845_v9, %v1844_v42  ;;  %v1852_v24 = vor.u32 %v1851_v1, %v1850_v44  ;;  %v1723_v4 = vand.u32 2139095040, %v5556_v13 }
 0x20a   : > { %v1701_v51 = vsel %vm1618_vm1, %v1700_v40, %v1699_v34  ;;  %v5580_v33 = vsub.s32 %v1572_v59, %v1575_v49  ;;  %v1849_v7 = vor.u32 %v1848_v50, %v1847_v8  ;;  %vm1514_vm1 = vcmp.lt.s32.totalorder %v5383_v38, 0 }
 0x20b   : > { %v1704_v48 = vsel %vm5473_vm0, %v5244_v54, %v1701_v51  ;;  %v1855_v63 = vor.u32 %v1854_v26, %v1853_v41  ;;  %vm1856_vm0 = vcmp.lt.s32.totalorder %v5568_v21, 1  ;;  %vm1859_vm2 = vcmp.lt.s32.totalorder %v5568_v21, 4 }
 0x20c   : > { %3991 = vcosq.f32 %v1704_v48  ;;  %v1578_v45 = vsub.s32 0, %v5580_v33  ;;  %v5590_v6 = vshll.u32 %v1832_v18, 8  ;;  %vm1715_vm3 = vcmp.eq.s32.totalorder %v5558_v35, 2 }
 0x20d   : > { %3993 = vsinq.f32 %v1704_v48  ;;  %vm3381_vm4 = vcmp.eq.s32.totalorder %v5560_v57, 2  ;;  %v1840_v17 = vshrl.u32 %v4074_v52, %v1839_v10  ;;  %vm1858_vm5 = vcmp.lt.s32.totalorder %v5568_v21, 3 }
 0x20e   : > { %v3742_v30 = vmin.u32 %v1578_v45, %v5580_v33  ;;  %v1864_v36 = vsel %vm1856_vm0, %v1843_v31, %v1846_v11  ;;  %v1865_v15 = vsel %vm1859_vm2, %v1852_v24, 920167782  ;;  %vm1712_vm6 = vcmp.eq.s32.totalorder %v5558_v35, 0 }
 0x20f   : > { %vm3378_vm7 = vcmp.eq.s32.totalorder %v5560_v57, 0  ;;  %v1861_v39 = vsel %vm1859_vm2, %v1849_v7, 2102212464  ;;  %v1868_v19 = vsel %vm1856_vm0, %v1846_v11, %v1849_v7  ;;  %v1724_v61 = vshrl.u32 %v1723_v4, 23 }
 0x210   : > { %v1580_v25 = vclz %v3742_v30  ;;  %vm1711_vm8 = vcmp.lt.s32.totalorder %v5558_v35, 2  ;;  %vm3377_vm9 = vcmp.lt.s32.totalorder %v5560_v57, 2  ;;  %v1598_v2 = vsub.s32 4, %v5562_v23 }
 0x211   : > { %vm1857_vm10 = vcmp.lt.s32.totalorder %v5568_v21, 2  ;;  %v1866_v20 = vsel %vm1858_vm5, %v1849_v7, %v1865_v15  ;;  %v1869_v22 = vsel %vm1859_vm2, %v1855_v63, 1326507024  ;;  %vm1708_vm11 = vweird.f32 %v5244_v54 }
 0x212   : > { %v3743_v14 = vadd.s32 4294967294, %v1580_v25  ;;  %v1860_v0 = vsel %vm1856_vm0, %v1840_v17, %v1843_v31  ;;  %v1867_v59 = vsel %vm1857_vm10, %v1864_v36, %v1866_v20  ;;  %v1870_v55 = vsel %vm1858_vm5, %v1852_v24, %v1869_v22 }
 0x213   : > { %v1862_v16 = vsel %vm1858_vm5, %v1846_v11, %v1861_v39  ;;  %v1871_v43 = vsel %vm1857_vm10, %v1868_v19, %v1870_v55  ;;  %v5626_v12 = vmul.u32.u64.low %v5590_v6, %v1867_v59  ;;  %v5627_v53 = vmul.u32.u64.high %v5590_v6, %v1867_v59, %v5626_v12 }
 0x214   : > { %vm3744_vm12 = vcmp.lt.s32.totalorder %v3743_v14, 0  ;;  %v5631_v47 = vmul.u32.u64.low %v5590_v6, %v1871_v43  ;;  %v5632_v10 = vmul.u32.u64.high %v5590_v6, %v1871_v43, %v5631_v47  ;;  %v3749_v34 = vadd.s32 4294967169, %v1724_v61 }
 0x215   : > { %v1568_v40 = vadd.s32 %v5515_v32, %v5528_v29  ;;  %v1583_v3 = vsel %vm3744_vm12, 0, %v3743_v14  ;;  %v1599_v9 = vsel %vm1514_vm1, %v1598_v2, %v5562_v23  ;;  %v1720_v1 = vand.u32 2147483647, %v5556_v13 }
 0x216   : > { %v3992_v18 = vpop.eup %3991  ;;  %v1584_v50 = vsub.s32 32, %v1583_v3  ;;  %v1588_v51 = vsub.s32 4294967266, %v1583_v3  ;;  %v1863_v42 = vsel %vm1857_vm10, %v1860_v0, %v1862_v16  ;;  %v1585_v26 = vshll.u32 %v5580_v33, %v1583_v3 }
 0x217   : > { %v3994_v49 = vpop.eup %3993  ;;  %v1716_v27 = vxor.u32 2147483648, %v3992_v18  ;;  %v1882_v48 = vadd.s32 1, %v5627_v53  ;;  %v1730_v32 = vadd.s32 1, %v3749_v34  ;;  %v1879_v33 = vmul.u32 %v5590_v6, %v1863_v42 }
 0x218   : > { %v1713_v44 = vxor.u32 2147483648, %v3994_v49  ;;  %v1586_v8 = vshrl.u32 %v1568_v40, %v1584_v50  ;;  %v1589_v41 = vadd.s32 127, %v1588_v51  ;;  %vm1881_vm13 = vc.u32 %v5632_v10, %v5626_v12 }
 0x219   : > { %v1717_v29 = vsel %vm1715_vm3, %v1716_v27, %v3994_v49  ;;  %v3383_v23 = vsel %vm3381_vm4, %v1716_v27, %v3994_v49  ;;  %v1883_v30 = vsel %vm1881_vm13, %v1882_v48, %v5627_v53  ;;  %vm1731_vm14 = vcmp.gt.s32.totalorder %v1730_v32, 0 }
 0x21a   : > { %v1714_v21 = vsel %vm1712_vm6, %v3992_v18, %v1713_v44  ;;  %v3380_v31 = vsel %vm3378_vm7, %v3992_v18, %v1713_v44  ;;  %v1587_v45 = vor.u32 %v1586_v8, %v1585_v26  ;;  %v1590_v7 = vshll.u32 %v1589_v41, 23 }
 0x21b   : > { %v1718_v11 = vsel %vm1711_vm8, %v1714_v21, %v1717_v29  ;;  %v3384_v24 = vsel %vm3377_vm9, %v3380_v31, %v3383_v23  ;;  %v1884_v17 = vadd.s32 %v1883_v30, %v1879_v33  ;;  %v1732_v35 = vsel %vm1731_vm14, %v1730_v32, 0 }
 0x21c   : > { %v1719_v4 = vsel %vm1708_vm11, nan, %v1718_v11  ;;  %v3385_v63 = vsel %vm1708_vm11, nan, %v3384_v24  ;;  %v1591_v6 = vor.u32 4788187, %v1590_v7  ;;  %vm5668_vm15 = vcmp.le.f32.partialorder %v1512_v28, 0.7853982 }
 0x21d   : > { %1941 = vst [vmem:[%s4455_s30 + $0xd0] sm:$0xff] %v1719_v4  ;;  %3605 = vst [vmem:[%s4455_s30 + $0xd8] sm:$0xff] %v3385_v63  ;;  %v1727_v36 = vand.u32 8388607, %v1720_v1  ;;  %v1734_v15 = vand.u32 31, %v1732_v35  ;;  %v1594_v25 = vcvt.s32.f32 %v1587_v45  ;;  %v1601_v39 = vsel %vm5668_vm15, 0, %v1599_v9 }
 0x21e   : > { %v1592_v54 = vand.u32 2147483647, %v1591_v6  ;;  %v1885_v19 = vadd.s32 536870912, %v1884_v17  ;;  %v1605_v22 = vadd.s32 3, %v1601_v39  ;;  %v1733_v16 = vshrl.u32 %v1732_v35, 5 }
 0x21f   : > { %v1735_v61 = vsub.s32 32, %v1734_v15  ;;  %v1728_v14 = vor.u32 8388608, %v1727_v36  ;;  %v1737_v40 = vshll.u32 %v4074_v52, %v1734_v15  ;;  %v1740_v3 = vshll.u32 %v4075_v56, %v1734_v15 }
 0x220   : > { %v1595_v2 = vmul.f32 %v1594_v25, %v1592_v54  ;;  %v5676_v20 = vshrl.u32 %v1885_v19, 30  ;;  %v1743_v49 = vshll.u32 %v4076_v58, %v1734_v15  ;;  %v1746_v27 = vshll.u32 %v4077_v60, %v1734_v15 }
 0x221   : > { %v1738_v59 = vshrl.u32 %v4075_v56, %v1735_v61  ;;  %v1741_v55 = vshrl.u32 %v4076_v58, %v1735_v61  ;;  %v1744_v43 = vshrl.u32 %v4077_v60, %v1735_v61  ;;  %v1747_v53 = vshrl.u32 %v4078_v62, %v1735_v61 }
 0x222   : > { %v1596_v28 = vxor.u32 2147483648, %v1595_v2  ;;  %v1887_v0 = vshll.u32 %v5676_v20, 30  ;;  %v1750_v47 = vshrl.u32 %v4079_v5, %v1735_v61  ;;  %v1749_v50 = vshll.u32 %v4078_v62, %v1734_v15 }
 0x223   : > { %v1739_v51 = vor.u32 %v1738_v59, %v1737_v40  ;;  %v1742_v42 = vor.u32 %v1741_v55, %v1740_v3  ;;  %v1745_v44 = vor.u32 %v1744_v43, %v1743_v49  ;;  %v1748_v26 = vor.u32 %v1747_v53, %v1746_v27 }
 0x224   : > { %v1597_v34 = vsel %vm1514_vm1, %v1596_v28, %v1595_v2  ;;  %v5686_v18 = vsub.s32 %v1884_v17, %v1887_v0  ;;  %v1751_v48 = vor.u32 %v1750_v47, %v1749_v50  ;;  %v3273_v56 = vand.u32 3, %v1601_v39 }
 0x225   : > { %v1600_v9 = vsel %vm5668_vm15, %v5383_v38, %v1597_v34  ;;  %v1606_v29 = vand.u32 3, %v1605_v22  ;;  %v1736_v23 = vshrl.u32 %v4074_v52, %v1735_v61  ;;  %vm1752_vm1 = vcmp.lt.s32.totalorder %v1733_v16, 1 }
 0x226   : > { %3995 = vcosq.f32 %v1600_v9  ;;  %v1890_v5 = vsub.s32 0, %v5686_v18  ;;  %v1768_v58 = vshll.u32 %v1728_v14, 8  ;;  %vm1754_vm0 = vcmp.lt.s32.totalorder %v1733_v16, 3 }
 0x227   : > { %3997 = vsinq.f32 %v1600_v9  ;;  %vm1755_vm2 = vcmp.lt.s32.totalorder %v1733_v16, 4  ;;  %v1760_v62 = vsel %vm1752_vm1, %v1739_v51, %v1742_v42  ;;  %v1764_v21 = vsel %vm1752_vm1, %v1742_v42, %v1745_v44 }
 0x228   : > { %v3754_v32 = vmin.u32 %v1890_v5, %v5686_v18  ;;  %v1757_v8 = vsel %vm1755_vm2, %v1745_v44, 2102212464  ;;  %v1761_v41 = vsel %vm1755_vm2, %v1748_v26, 920167782  ;;  %v1765_v31 = vsel %vm1755_vm2, %v1751_v48, 1326507024 }
 0x229   : > { %vm3274_vm3 = vcmp.lt.s32.totalorder %v3273_v56, 2  ;;  %vm1753_vm4 = vcmp.lt.s32.totalorder %v1733_v16, 2  ;;  %v1762_v11 = vsel %vm1754_vm0, %v1745_v44, %v1761_v41  ;;  %v1766_v24 = vsel %vm1754_vm0, %v1748_v26, %v1765_v31 }
 0x22a   : > { %v1892_v60 = vclz %v3754_v32  ;;  %vm1604_vm5 = vweird.f32 %v5383_v38  ;;  %vm3275_vm6 = vcmp.eq.s32.totalorder %v3273_v56, 0  ;;  %v1756_v52 = vsel %vm1752_vm1, %v1736_v23, %v1739_v51 }
 0x22b   : > { %v1763_v45 = vsel %vm1753_vm4, %v1760_v62, %v1762_v11  ;;  %v1767_v7 = vsel %vm1753_vm4, %v1764_v21, %v1766_v24  ;;  %v1758_v4 = vsel %vm1754_vm0, %v1742_v42, %v1757_v8  ;;  %vm3278_vm8 = vcmp.eq.s32.totalorder %v3273_v56, 2 }
 0x22c   : > { %v3755_v33 = vadd.s32 4294967294, %v1892_v60  ;;  %v5708_v63 = vmul.u32.u64.low %v1768_v58, %v1767_v7  ;;  %v5709_v30 = vmul.u32.u64.high %v1768_v58, %v1767_v7, %v5708_v63  ;;  %vm1607_vm9 = vcmp.lt.s32.totalorder %v1606_v29, 2 }
 0x22d   : > { %v5711_v17 = vmul.u32.u64.low %v1768_v58, %v1763_v45  ;;  %v5712_v35 = vmul.u32.u64.high %v1768_v58, %v1763_v45, %v5711_v17  ;;  %v1880_v36 = vadd.s32 %v5626_v12, %v5632_v10  ;;  %vm1608_vm10 = vcmp.eq.s32.totalorder %v1606_v29, 0 }
 0x22e   : > { %vm3756_vm7 = vcmp.lt.s32.totalorder %v3755_v33, 0  ;;  %vm1611_vm11 = vcmp.eq.s32.totalorder %v1606_v29, 2  ;;  %v1759_v19 = vsel %vm1753_vm4, %v1756_v52, %v1758_v4  ;;  %v1910_v51 = vsub.s32 4, %v5676_v20 }
 0x22f   : > { %v1895_v6 = vsel %vm3756_vm7, 0, %v3755_v33  ;;  %vm1777_vm12 = vc.u32 %v5709_v30, %v5711_v17  ;;  %v1778_v12 = vadd.s32 1, %v5712_v35  ;;  %v1775_v47 = vmul.u32 %v1768_v58, %v1759_v19 }
 0x230   : > { %v3996_v57 = vpop.eup %3995  ;;  %v1896_v15 = vsub.s32 32, %v1895_v6  ;;  %v1900_v54 = vsub.s32 4294967266, %v1895_v6  ;;  %v1897_v2 = vshll.u32 %v5686_v18, %v1895_v6  ;;  %vm1826_vm13 = vcmp.lt.s32.totalorder %v5446_v37, 0 }
 0x231   : > { %v3998_v25 = vpop.eup %3997  ;;  %v1612_v39 = vxor.u32 2147483648, %v3996_v57  ;;  %v1779_v34 = vsel %vm1777_vm12, %v1778_v12, %v5712_v35  ;;  %vm1825_vm14 = vcmp.le.f32.partialorder %v1824_v46, 0.7853982  ;;  %v1911_v48 = vsel %vm1826_vm13, %v1910_v51, %v5676_v20 }
 0x232   : > { %v1609_v61 = vxor.u32 2147483648, %v3998_v25  ;;  %v1898_v22 = vshrl.u32 %v1880_v36, %v1896_v15  ;;  %v1901_v14 = vadd.s32 127, %v1900_v54  ;;  %v1780_v9 = vadd.s32 %v1779_v34, %v1775_v47 }
 0x233   : > { %v1613_v28 = vsel %vm1611_vm11, %v1612_v39, %v3998_v25  ;;  %v3280_v0 = vsel %vm3278_vm8, %v1612_v39, %v3998_v25  ;;  %v1913_v29 = vsel %vm1825_vm14, 0, %v1911_v48  ;;  %vm1916_vm1 = vweird.f32 %v5446_v37 }
 0x234   : > { %v1610_v10 = vsel %vm1608_vm10, %v3996_v57, %v1609_v61  ;;  %v3277_v59 = vsel %vm3275_vm6, %v3996_v57, %v1609_v61  ;;  %v1899_v55 = vor.u32 %v1898_v22, %v1897_v2  ;;  %v1902_v16 = vshll.u32 %v1901_v14, 23 }
 0x235   : > { %v1614_v43 = vsel %vm1607_vm9, %v1610_v10, %v1613_v28  ;;  %v3281_v53 = vsel %vm3274_vm3, %v3277_v59, %v3280_v0  ;;  %v1781_v50 = vadd.s32 536870912, %v1780_v9  ;;  %v1917_v60 = vadd.s32 3, %v1913_v29 }
 0x236   : > { %v1615_v18 = vsel %vm1604_vm5, nan, %v1614_v43  ;;  %v3282_v40 = vsel %vm1604_vm5, nan, %v3281_v53  ;;  %v1903_v3 = vor.u32 4788187, %v1902_v16  ;;  %v1906_v27 = vcvt.s32.f32 %v1899_v55 }
 0x237   : > { %1940 = vst [vmem:[%s4455_s30 + $0xc0] sm:$0xff] %v1615_v18  ;;  %3604 = vst [vmem:[%s4455_s30 + $0xc8] sm:$0xff] %v3282_v40  ;;  %v1782_v42 = vshrl.u32 %v1781_v50, 30  ;;  %v3582_v8 = vand.u32 3, %v1913_v29  ;;  %v1918_v21 = vand.u32 3, %v1917_v60  ;;  %v1776_v11 = vadd.s32 %v5711_v17, %v5709_v30 }
 0x238   : > { %v1904_v49 = vand.u32 2147483647, %v1903_v3  ;;  %vm1722_vm7 = vcmp.lt.s32.totalorder %v5556_v13, 0  ;;  %vm1721_vm8 = vcmp.le.f32.partialorder %v1720_v1, 0.7853982 }
 0x239   : > { %v1783_v26 = vshll.u32 %v1782_v42, 30  ;;  %vm3584_vm0 = vcmp.eq.s32.totalorder %v3582_v8, 0  ;;  %vm3587_vm2 = vcmp.eq.s32.totalorder %v3582_v8, 2  ;;  %vm1920_vm3 = vcmp.eq.s32.totalorder %v1918_v21, 0 }
 0x23a   : > { %v1907_v5 = vmul.f32 %v1906_v27, %v1904_v49  ;;  %vm1923_vm4 = vcmp.eq.s32.totalorder %v1918_v21, 2  ;;  %vm1919_vm5 = vcmp.lt.s32.totalorder %v1918_v21, 2  ;;  %vm3583_vm6 = vcmp.lt.s32.totalorder %v3582_v8, 2 }
 0x23b   : > { %v1784_v32 = vsub.s32 %v1780_v9, %v1783_v26  ;;  %v1806_v14 = vsub.s32 4, %v1782_v42 }
 0x23c   : > { %v1908_v44 = vxor.u32 2147483648, %v1907_v5 }
 0x23d   : > { %v1786_v23 = vsub.s32 0, %v1784_v32  ;;  %v1807_v12 = vsel %vm1722_vm7, %v1806_v14, %v1782_v42 }
 0x23e   : > { %v1909_v38 = vsel %vm1826_vm13, %v1908_v44, %v1907_v5  ;;  %v1809_v10 = vsel %vm1721_vm8, 0, %v1807_v12 }
 0x23f   : > { %v1912_v56 = vsel %vm1825_vm14, %v5446_v37, %v1909_v38  ;;  %v3750_v58 = vmin.u32 %v1786_v23, %v1784_v32  ;;  %v1813_v59 = vadd.s32 3, %v1809_v10  ;;  %v3479_v16 = vand.u32 3, %v1809_v10 }
 0x240   : > { %3999 = vcosq.f32 %v1912_v56 }
 0x241   : > { %4001 = vsinq.f32 %v1912_v56  ;;  %v1788_v62 = vclz %v3750_v58  ;;  %v1814_v55 = vand.u32 3, %v1813_v59  ;;  %vm3484_vm10 = vcmp.eq.s32.totalorder %v3479_v16, 2 }
 0x242   : > { %vm3481_vm12 = vcmp.eq.s32.totalorder %v3479_v16, 0  ;;  %vm3480_vm14 = vcmp.lt.s32.totalorder %v3479_v16, 2 }
 0x243   : > { %v3751_v41 = vadd.s32 4294967294, %v1788_v62  ;;  %vm1819_vm9 = vcmp.eq.s32.totalorder %v1814_v55, 2  ;;  %vm1816_vm11 = vcmp.eq.s32.totalorder %v1814_v55, 0  ;;  %vm1815_vm13 = vcmp.lt.s32.totalorder %v1814_v55, 2 }
 0x245   : > { %vm3752_vm15 = vcmp.lt.s32.totalorder %v3751_v41, 0 }
 0x246   : > { %v1791_v46 = vsel %vm3752_vm15, 0, %v3751_v41  ;;  %vm1812_vm15 = vweird.f32 %v5556_v13 }
 0x247   : > { %v1792_v24 = vsub.s32 32, %v1791_v46  ;;  %v1796_v52 = vsub.s32 4294967266, %v1791_v46  ;;  %v1793_v7 = vshll.u32 %v1784_v32, %v1791_v46 }
 0x249   : > { %v1794_v6 = vshrl.u32 %v1776_v11, %v1792_v24  ;;  %v1797_v35 = vadd.s32 127, %v1796_v52 }
 0x24a   : > { %v4000_v31 = vpop.eup %3999 }
 0x24b   : > { %v4002_v20 = vpop.eup %4001  ;;  %v1924_v33 = vxor.u32 2147483648, %v4000_v31  ;;  %v1795_v30 = vor.u32 %v1794_v6, %v1793_v7  ;;  %v1798_v17 = vshll.u32 %v1797_v35, 23 }
 0x24c   : > { %v1921_v45 = vxor.u32 2147483648, %v4002_v20 }
 0x24d   : > { %v1925_v4 = vsel %vm1923_vm4, %v1924_v33, %v4002_v20  ;;  %v3589_v63 = vsel %vm3587_vm2, %v1924_v33, %v4002_v20  ;;  %v1799_v19 = vor.u32 4788187, %v1798_v17  ;;  %v1802_v2 = vcvt.s32.f32 %v1795_v30 }
 0x24e   : > { %v1922_v57 = vsel %vm1920_vm3, %v4000_v31, %v1921_v45  ;;  %v3586_v36 = vsel %vm3584_vm0, %v4000_v31, %v1921_v45 }
 0x24f   : > { %v1926_v15 = vsel %vm1919_vm5, %v1922_v57, %v1925_v4  ;;  %v3590_v54 = vsel %vm3583_vm6, %v3586_v36, %v3589_v63  ;;  %v1800_v61 = vand.u32 2147483647, %v1799_v19 }
 0x250   : > { %v1927_v25 = vsel %vm1916_vm1, nan, %v1926_v15  ;;  %v3591_v39 = vsel %vm1916_vm1, nan, %v3590_v54 }
 0x251   : > { %1943 = vst [vmem:[%s4455_s30 + $0xf0] sm:$0xff] %v1927_v25  ;;  %3607 = vst [vmem:[%s4455_s30 + $0xf8] sm:$0xff] %v3591_v39  ;;  %v1803_v22 = vmul.f32 %v1802_v2, %v1800_v61 }
 0x253   : > { %v1804_v28 = vxor.u32 2147483648, %v1803_v22 }
 0x255   : > { %v1805_v0 = vsel %vm1722_vm7, %v1804_v28, %v1803_v22 }
 0x256   : > { %v1808_v37 = vsel %vm1721_vm8, %v5556_v13, %v1805_v0 }
 0x257   : > { %4003 = vcosq.f32 %v1808_v37 }
 0x258   : > { %4005 = vsinq.f32 %v1808_v37 }
 0x261   : > { %v4004_v43 = vpop.eup %4003 }
 0x262   : > { %v4006_v53 = vpop.eup %4005  ;;  %v1820_v47 = vxor.u32 2147483648, %v4004_v43 }
 0x263   : > { %v1817_v34 = vxor.u32 2147483648, %v4006_v53 }
 0x264   : > { %v1821_v1 = vsel %vm1819_vm9, %v1820_v47, %v4006_v53  ;;  %v3486_v18 = vsel %vm3484_vm10, %v1820_v47, %v4006_v53 }
 0x265   : > { %v1818_v40 = vsel %vm1816_vm11, %v4004_v43, %v1817_v34  ;;  %v3483_v3 = vsel %vm3481_vm12, %v4004_v43, %v1817_v34 }
 0x266   : > { %v1822_v9 = vsel %vm1815_vm13, %v1818_v40, %v1821_v1  ;;  %v3487_v49 = vsel %vm3480_vm14, %v3483_v3, %v3486_v18 }
 0x267   : > { %v1823_v27 = vsel %vm1812_vm15, nan, %v1822_v9  ;;  %v3488_v50 = vsel %vm1812_vm15, nan, %v3487_v49 }
 0x268   : > { %1942 = vst [vmem:[%s4455_s30 + $0xe0] sm:$0xff] %v1823_v27  ;;  %3606 = vst [vmem:[%s4455_s30 + $0xe8] sm:$0xff] %v3488_v50 }
 0x269   : > { %4022 = shalt.err (!%p4019_p3)
}
 0x26a   : > { %s4023_s25 = scalar_lea.hbm %s5758_s13, 4096  ;;  %s4027_s28 = scalar_lea.hbm %s5810_s2, 8192 }
 0x26b   : > { %p4024_p4 = scmp.ne.s32.totalorder %s5758_s13, %s4023_s25  ;;  %p4028_p9 = scmp.lt.u32.totalorder %s5758_s13, %s5810_s2 }
 0x26c   : > { %p4029_p10 = scmp.lt.u32.totalorder %s4027_s28, %s4023_s25  ;;  %p4031_p12 = scmp.lt.u32.totalorder %s4023_s25, %s5758_s13 }
 0x26d   : > { %p4025_p7 = pnand %p4024_p4, %p4136_p5 }
 0x26e   : > { %p4030_p11 = por %p4029_p10, %p4028_p9 }
 0x26f   : > { %p4026_p8 = pneg %p4025_p7 }
 0x270   : > { %p4032_p13 = por %p4031_p12, %p4030_p11 }
 0x272   : > { %p4033_p0 = pnand %p4032_p13, %p4026_p8 }
 0x274   : > { %4036 = shalt.err (!%p4033_p0)
}
 0x275   : > { %s4081_s3 = smov 256   ;;  %s4082_s4 = smov 16  }
 0x276   : > { %3893 = dma.vmem_to_hbm [thread:$0]  (%p4136_p5), %s5760_s8, 4096, %s5758_s13, %s5767_s17, %s4081_s3, %s4081_s3, %s4082_s4  }
 0x277 PF: > { %p3899_p1 = scmp.ge.s32.totalorder %s4071_s12, 2  ;;  %s3638_s5 = sand.u32 1, %s4059_s9  }
 0x278   : > { %s3639_s6 = scalar_lea.sflag [#allocation3], %s3638_s5 }
 0x279   : > { %p3896_p2 = pnand %p3899_p1, %p4140_p6 }
 0x27b   : > { %4054 = dma.done.wait (!%p3896_p2), %s3639_s6, 4096  }
 0x27c   : > { %4056 = vsyncadd (!%p3896_p2), %s3639_s6, 4294963200  ;;  %p12_p3 = scmp.ge.s32.totalorder %s4123_s15, 4   ;;  %s5841_s9 = smov %s4063_s10 }
 0x27d   : > { %s5842_s10 = smov %s4067_s11  ;;  %s5843_s11 = smov %s4134_s18 }
 0x27e   : > { %s5844_s12 = smov %s4123_s15  ;;  %14 = sbr.rel (!%p12_p3) target bundleno = 3 (0x3), region = 63 }
 0x285   :  { %3644 = vsyncpa [#allocation3], 1 }
 0x286   :  { %3646 = vsyncpa [#allocation3 + $0x1], 1 }

</bundles_post_ra>
